<compile_context>
chip_gen: v7x
topology: tpu7x:2x2x1
jax: 0.10.0
libtpu: 0.0.40
codegen_flags: <defaults>
</compile_context>

<pallas_src>
import jax
import jax.numpy as jnp
from jax.experimental import pallas as pl
from jax.experimental.pallas import tpu as pltpu

N = 128                       # system size (8 x 8 lattice x 2 spinor components)
LAT = 8
NUM_TRI = N * (N + 1) // 2    # 8256 packed lower-triangular entries
KAPPA = 0.276


# ---------------------------------------------------------------------------
# DDOpt stand-in.
# TODO(synk): DDOpt is an external dependency injected into K_Loss (the NeuralPC
# Dirac operator); this gauge-covariant hopping operator only mirrors its linear
# (B, 8, 8, 2) x U1 -> (B, 8, 8, 2) interface so the script is self-contained.
# ---------------------------------------------------------------------------
def ddopt_standin(x, U1, kappa=KAPPA):
    u0 = U1[:, 0][..., None]          # (B, 8, 8, 1) links, lattice direction 0
    u1 = U1[:, 1][..., None]          # (B, 8, 8, 1) links, lattice direction 1
    hop = (u0 * jnp.roll(x, -1, axis=1)
           + jnp.conj(jnp.roll(u0, 1, axis=1)) * jnp.roll(x, 1, axis=1)
           + u1 * jnp.roll(x, -1, axis=2)
           + jnp.conj(jnp.roll(u1, 1, axis=2)) * jnp.roll(x, 1, axis=2))
    return x - kappa * hop


# ---------------------------------------------------------------------------
# Glue: dense L (gather, no scatter) and dense D (one batched DDOpt call).
# ---------------------------------------------------------------------------
def _build_L(net_out):
    """Dense lower-triangular L from row-major packed net_out (B, 8256)."""
    b = net_out.shape[0]
    i = jnp.arange(N)[:, None]
    j = jnp.arange(N)[None, :]
    tril = j <= i
    packed = jnp.where(tril, (i * (i + 1)) // 2 + j, 0)        # row-major packing
    vals = jnp.take(net_out.astype(jnp.complex64), packed.reshape(-1), axis=1)
    return jnp.where(tril.reshape(1, N, N), vals.reshape(b, N, N), 0)


def _build_D(U1, ddopt):
    """Dense matrix of the linear operator DDOpt: column i = DDOpt(e_i).

    All B*N unit-vector applications are done as a single batched operator
    call (columns folded into the batch axis); the same application set also
    provides Re tr(D) (= trace2) for free.
    """
    b = U1.shape[0]
    eye = jnp.eye(N, dtype=jnp.complex64)                       # row i == e_i
    x = jnp.broadcast_to(eye.reshape(1, N, LAT, LAT, 2), (b, N, LAT, LAT, 2))
    x = x.reshape(b * N, LAT, LAT, 2)
    u_rep = jnp.repeat(U1, N, axis=0)                           # (b*N, 2, 8, 8)
    y = ddopt(x, u_rep, kappa=KAPPA).reshape(b, N, N)           # y[b, i, :] = D e_i
    return jnp.swapaxes(y, -1, -2)                              # (B, N, N), D[:, :, i]


# ---------------------------------------------------------------------------
# Pallas kernel: per TB-sized batch block, compute the per-element loss term
#   trace / trace2 * exp(-log|det L|)
# plus the raw stats, from f32 real/imag planes.
# Inputs (TB, 128, 128): LrT, LiT (transposed L planes), Dr, DiA = Im(D)-Im(D)^T.
# 3 MXU matmuls per batch element, diag-only EUP logs, one (TB, 128) store.
# ---------------------------------------------------------------------------
def _kloss_kernel(lrT_ref, liT_ref, dr_ref, dia_ref, out_ref):
    lrT = lrT_ref[...]          # (TB, N, N)
    liT = liT_ref[...]
    dr = dr_ref[...]
    dia = dia_ref[...]          # Im(D) - Im(D)^T (precomputed in the wrapper)

    # Gram matrix G = L^H L via the contract-last-dims (A @ B^T) MXU form.
    # Precision decision: f32 operands, f32 accumulation (no bf16 cast — the
    # torch reference is cdouble and tolerance is 2e-3).
    gr = (jnp.einsum('bij,bkj->bik', lrT, lrT, preferred_element_type=jnp.float32)
          + jnp.einsum('bij,bkj->bik', liT, liT, preferred_element_type=jnp.float32))
    p = jnp.einsum('bij,bkj->bik', lrT, liT, preferred_element_type=jnp.float32)

    # Re tr(L D L^H) = Re tr(D G) = sum(Dr .* Gr) + sum((Im D - Im D^T) .* P)
    # (Gr symmetric, Im G = P - P^T antisymmetric.)
    t = jnp.sum(dr * gr + dia * p, axis=-1)                     # (TB, N)
    trace = jnp.sum(t, axis=-1, keepdims=True)                  # (TB, 1)

    # Diagonals (transpose-invariant) -> only 128 log() EUP pushes per element.
    row = jax.lax.broadcasted_iota(jnp.int32, (N, N), 0)
    col = jax.lax.broadcasted_iota(jnp.int32, (N, N), 1)
    on_diag = (row == col)[None]                                # (1, N, N)

    dr_diag = jnp.sum(jnp.where(on_diag, dr, 0.0), axis=-2)     # (TB, N)
    lr_diag = jnp.sum(jnp.where(on_diag, lrT, 0.0), axis=-2)
    li_diag = jnp.sum(jnp.where(on_diag, liT, 0.0), axis=-2)

    trace2 = jnp.sum(dr_diag, axis=-1, keepdims=True)           # (TB, 1)
    logabsdet = 0.5 * jnp.sum(jnp.log(lr_diag * lr_diag + li_diag * li_diag),
                              axis=-1, keepdims=True)           # (TB, 1)

    # Per-element loss term; ratio-then-rescale keeps trace2 * |det L| from
    # overflowing f32 when the determinant spans many orders of magnitude.
    loss_b = (trace / trace2) * jnp.exp(-logabsdet)             # (TB, 1)

    # Single lane-dense output block, written exactly once per grid step.
    lane = jax.lax.broadcasted_iota(jnp.int32, out_ref.shape, 1)
    out_ref[...] = (jnp.where(lane == 0, loss_b, 0.0)
                    + jnp.where(lane == 1, trace, 0.0)
                    + jnp.where(lane == 2, trace2, 0.0)
                    + jnp.where(lane == 3, logabsdet, 0.0))


def _kloss_stats(lrT, liT, dr, dia):
    b = lrT.shape[0]
    tb = b if b <= 8 else 8                    # 8 elems / step once batch is big
    b_pad = pl.cdiv(b, tb) * tb
    if b_pad != b:                             # pad; junk rows are sliced off below
        pad = ((0, b_pad - b), (0, 0), (0, 0))
        lrT, liT, dr, dia = (jnp.pad(a, pad) for a in (lrT, liT, dr, dia))

    mat_spec = pl.BlockSpec((tb, N, N), lambda i: (i, 0, 0))
    out_spec = pl.BlockSpec((tb, 128), lambda i: (i, 0))

    cost = pl.CostEstimate(
        flops=b_pad * (3 * 2 * N * N * N + 8 * N * N),
        transcendentals=b_pad * (N + 1),
        bytes_accessed=4 * b_pad * N * N * 4 + b_pad * 128 * 4,
    )

    stats = pl.pallas_call(
        _kloss_kernel,
        out_shape=jax.ShapeDtypeStruct((b_pad, 128), jnp.float32),
        grid_spec=pltpu.PrefetchScalarGridSpec(
            num_scalar_prefetch=0,
            grid=(b_pad // tb,),
            in_specs=[mat_spec, mat_spec, mat_spec, mat_spec],
            out_specs=out_spec,
        ),
        compiler_params=pltpu.CompilerParams(
            dimension_semantics=("parallel",),          # batch blocks across TCs (v7x)
            vmem_limit_bytes=48 * 1024 * 1024,          # headroom for TB=8 f32 tiles
        ),
        cost_estimate=cost,
    )(lrT, liT, dr, dia)
    return stats[:b]


# ---------------------------------------------------------------------------
# K_Loss forward (mirrors K_Loss(DDOpt).forward(net_out, U1)).
# ---------------------------------------------------------------------------
def k_loss(net_out, U1, ddopt=ddopt_standin):
    L = _build_L(net_out)                       # (B, N, N) complex64
    D = _build_D(U1, ddopt)                     # (B, N, N) complex64

    # f32 planes for the kernel (Pallas TPU has no complex dtype / no f64).
    LT = jnp.swapaxes(L, -1, -2)
    LrT = jnp.real(LT).astype(jnp.float32)
    LiT = jnp.imag(LT).astype(jnp.float32)
    Dr = jnp.real(D).astype(jnp.float32)
    Di = jnp.imag(D).astype(jnp.float32)
    DiA = Di - jnp.swapaxes(Di, -1, -2)         # antisymmetrised Im(D)

    stats = _kloss_stats(LrT, LiT, Dr, DiA)     # (B, 128): lane 0 = per-batch loss
    return jnp.mean(stats[:, 0])


# Pure-JAX reference of the same math (for the correctness check below).
def k_loss_reference(net_out, U1, ddopt=ddopt_standin):
    L = _build_L(net_out)
    D = _build_D(U1, ddopt)
    Lh = jnp.conj(jnp.swapaxes(L, -1, -2))
    M = jnp.einsum("bij,bjk,bkl->bil", L, D, Lh,
                   precision=jax.lax.Precision.HIGHEST)
    trace = jnp.real(jnp.trace(M, axis1=-2, axis2=-1))
    trace2 = jnp.real(jnp.trace(D, axis1=-2, axis2=-1))
    diag = jnp.diagonal(L, axis1=-2, axis2=-1)
    ll_det = jnp.abs(jnp.exp(jnp.sum(jnp.log(diag), axis=-1)))
    return jnp.mean(trace / (trace2 * ll_det))


if __name__ == "__main__":
    key = jax.random.PRNGKey(0)
    k1, k2, k3 = jax.random.split(key, 3)
    B = 2

    # Packed lower-triangular net_out (B, 8256), complex. Keep the diagonal near 1
    # so |det L| stays in a sane range for the demo (the reference itself notes the
    # determinant spans many orders of magnitude).
    net = 0.05 * (jax.random.normal(k1, (B, NUM_TRI), jnp.float32)
                  + 1j * jax.random.normal(k2, (B, NUM_TRI), jnp.float32))
    diag_pos = jnp.arange(N) * (jnp.arange(N) + 3) // 2   # packed index of L_ii
    net_out = net.astype(jnp.complex64).at[:, diag_pos].add(1.0 + 0.0j)

    # U(1) gauge links on the 8x8 lattice, two directions, unit modulus.
    theta = jax.random.normal(k3, (B, 2, LAT, LAT), jnp.float32)
    U1 = jnp.exp(1j * theta).astype(jnp.complex64)

    loss_fn = jax.jit(lambda no, u: k_loss(no, u, ddopt_standin))
    out = loss_fn(net_out, U1)
    jax.block_until_ready(out)

    ref = k_loss_reference(net_out, U1, ddopt_standin)
    assert bool(jnp.isfinite(out)), out
    assert jnp.allclose(out, ref, rtol=2e-3, atol=2e-3), (out, ref)

    print("KERNEL_OK")
</pallas_src>

<mosaic_0001>
module attributes {stable_mosaic.version = 11 : i64} {
  func.func private @main(%arg0: i32) attributes {dimension_semantics = [#tpu.dimension_semantics<core_parallel>], iteration_bounds = array<i64: 2>, tpu.core_type = #tpu.core_type<sc_scalar_subcore>, window_params = []} {
    return
  }
}

module attributes {stable_mosaic.version = 11 : i64} {
  func.func private @main(%arg0: i32) attributes {dimension_semantics = [#tpu.dimension_semantics<core_parallel>], iteration_bounds = array<i64: 2>, tpu.core_type = #tpu.core_type<sc_scalar_subcore>, window_params = []} {
    return
  }
}

module attributes {stable_mosaic.version = 11 : i64} {
  func.func @_kloss_kernel(%arg0: i32, %arg1: memref<2x128x128xf32, #tpu.memory_space<vmem>>, %arg2: memref<2x128x128xf32, #tpu.memory_space<vmem>>, %arg3: memref<2x128x128xf32, #tpu.memory_space<vmem>>, %arg4: memref<2x128x128xf32, #tpu.memory_space<vmem>>, %arg5: memref<2x128xf32, #tpu.memory_space<vmem>>) attributes {dimension_semantics = [#tpu.dimension_semantics<parallel>], iteration_bounds = array<i64: 1>, scalar_prefetch = 0 : i64, scratch_operands = 0 : i64, tpu.core_type = #tpu.core_type<tc>, window_params = [{transform_indices = @transform_0, window_bounds = array<i64: 2, 128, 128>}, {transform_indices = @transform_1, window_bounds = array<i64: 2, 128, 128>}, {transform_indices = @transform_2, window_bounds = array<i64: 2, 128, 128>}, {transform_indices = @transform_3, window_bounds = array<i64: 2, 128, 128>}, {transform_indices = @transform_4, window_bounds = array<i64: 2, 128>}]} {
    %c0 = arith.constant 0 : index
    %c0_0 = arith.constant 0 : index
    %c0_1 = arith.constant 0 : index
    %0 = vector.load %arg1[%c0, %c0_0, %c0_1] : memref<2x128x128xf32, #tpu.memory_space<vmem>>, vector<2x128x128xf32>
    %c0_2 = arith.constant 0 : index
    %c0_3 = arith.constant 0 : index
    %c0_4 = arith.constant 0 : index
    %1 = vector.load %arg2[%c0_2, %c0_3, %c0_4] : memref<2x128x128xf32, #tpu.memory_space<vmem>>, vector<2x128x128xf32>
    %c0_5 = arith.constant 0 : index
    %c0_6 = arith.constant 0 : index
    %c0_7 = arith.constant 0 : index
    %2 = vector.load %arg3[%c0_5, %c0_6, %c0_7] : memref<2x128x128xf32, #tpu.memory_space<vmem>>, vector<2x128x128xf32>
    %c0_8 = arith.constant 0 : index
    %c0_9 = arith.constant 0 : index
    %c0_10 = arith.constant 0 : index
    %3 = vector.load %arg4[%c0_8, %c0_9, %c0_10] : memref<2x128x128xf32, #tpu.memory_space<vmem>>, vector<2x128x128xf32>
    "tpu.trace_start"() <{level = 10 : i32, message = "bij,bkj->bik"}> : () -> ()
    %cst = arith.constant dense<0.000000e+00> : vector<2x128x128xf32>
    %4 = tpu.matmul %0, %0, %cst {dimension_numbers = #tpu.dot_dimension_numbers<[2], [2], [1], [1], [0, 0, 0, 1, 1, 1], [0], [0]>} : vector<2x128x128xf32>, vector<2x128x128xf32>, vector<2x128x128xf32> -> vector<2x128x128xf32>
    %cst_11 = arith.constant dense<0.000000e+00> : vector<2x128x128xf32>
    %5 = tpu.matmul %1, %1, %cst_11 {dimension_numbers = #tpu.dot_dimension_numbers<[2], [2], [1], [1], [0, 0, 0, 1, 1, 1], [0], [0]>} : vector<2x128x128xf32>, vector<2x128x128xf32>, vector<2x128x128xf32> -> vector<2x128x128xf32>
    "tpu.trace_stop"() : () -> ()
    %6 = arith.addf %4, %5 : vector<2x128x128xf32>
    "tpu.trace_start"() <{level = 10 : i32, message = "bij,bkj->bik"}> : () -> ()
    %cst_12 = arith.constant dense<0.000000e+00> : vector<2x128x128xf32>
    %7 = tpu.matmul %0, %1, %cst_12 {dimension_numbers = #tpu.dot_dimension_numbers<[2], [2], [1], [1], [0, 0, 0, 1, 1, 1], [0], [0]>} : vector<2x128x128xf32>, vector<2x128x128xf32>, vector<2x128x128xf32> -> vector<2x128x128xf32>
    "tpu.trace_stop"() : () -> ()
    %8 = arith.mulf %2, %6 : vector<2x128x128xf32>
    %9 = arith.mulf %3, %7 : vector<2x128x128xf32>
    %10 = arith.addf %8, %9 : vector<2x128x128xf32>
    %cst_13 = arith.constant dense<0.000000e+00> : vector<2x128xf32>
    %11 = vector.multi_reduction <add>, %10, %cst_13 [2] : vector<2x128x128xf32> to vector<2x128xf32>
    %cst_14 = arith.constant dense<0.000000e+00> : vector<2xf32>
    %12 = vector.multi_reduction <add>, %11, %cst_14 [1] : vector<2x128xf32> to vector<2xf32>
    %13 = vector.shape_cast %12 : vector<2xf32> to vector<2x1xf32>
    %14 = tpu.iota {dimensions = array<i32: 0>} : vector<128x128xi32>
    %15 = tpu.iota {dimensions = array<i32: 1>} : vector<128x128xi32>
    %16 = arith.cmpi eq, %14, %15 : vector<128x128xi32>
    %17 = vector.shape_cast %16 : vector<128x128xi1> to vector<1x128x128xi1>
    %cst_15 = arith.constant 0.000000e+00 : f32
    %18 = vector.shape_cast %17 : vector<1x128x128xi1> to vector<1x128x128xi1>
    %19 = vector.broadcast %18 : vector<1x128x128xi1> to vector<2x128x128xi1>
    %20 = vector.broadcast %cst_15 : f32 to vector<2x128x128xf32>
    %21 = arith.select %19, %2, %20 : vector<2x128x128xi1>, vector<2x128x128xf32>
    %cst_16 = arith.constant dense<0.000000e+00> : vector<2x128xf32>
    %22 = vector.multi_reduction <add>, %21, %cst_16 [1] : vector<2x128x128xf32> to vector<2x128xf32>
    %cst_17 = arith.constant 0.000000e+00 : f32
    %23 = vector.shape_cast %17 : vector<1x128x128xi1> to vector<1x128x128xi1>
    %24 = vector.broadcast %23 : vector<1x128x128xi1> to vector<2x128x128xi1>
    %25 = vector.broadcast %cst_17 : f32 to vector<2x128x128xf32>
    %26 = arith.select %24, %0, %25 : vector<2x128x128xi1>, vector<2x128x128xf32>
    %cst_18 = arith.constant dense<0.000000e+00> : vector<2x128xf32>
    %27 = vector.multi_reduction <add>, %26, %cst_18 [1] : vector<2x128x128xf32> to vector<2x128xf32>
    %cst_19 = arith.constant 0.000000e+00 : f32
    %28 = vector.shape_cast %17 : vector<1x128x128xi1> to vector<1x128x128xi1>
    %29 = vector.broadcast %28 : vector<1x128x128xi1> to vector<2x128x128xi1>
    %30 = vector.broadcast %cst_19 : f32 to vector<2x128x128xf32>
    %31 = arith.select %29, %1, %30 : vector<2x128x128xi1>, vector<2x128x128xf32>
    %cst_20 = arith.constant dense<0.000000e+00> : vector<2x128xf32>
    %32 = vector.multi_reduction <add>, %31, %cst_20 [1] : vector<2x128x128xf32> to vector<2x128xf32>
    %cst_21 = arith.constant dense<0.000000e+00> : vector<2xf32>
    %33 = vector.multi_reduction <add>, %22, %cst_21 [1] : vector<2x128xf32> to vector<2xf32>
    %34 = vector.shape_cast %33 : vector<2xf32> to vector<2x1xf32>
    %35 = arith.mulf %27, %27 : vector<2x128xf32>
    %36 = arith.mulf %32, %32 : vector<2x128xf32>
    %37 = arith.addf %35, %36 : vector<2x128xf32>
    %38 = math.log %37 : vector<2x128xf32>
    %cst_22 = arith.constant dense<0.000000e+00> : vector<2xf32>
    %39 = vector.multi_reduction <add>, %38, %cst_22 [1] : vector<2x128xf32> to vector<2xf32>
    %40 = vector.shape_cast %39 : vector<2xf32> to vector<2x1xf32>
    %cst_23 = arith.constant 5.000000e-01 : f32
    %41 = vector.broadcast %cst_23 : f32 to vector<2x1xf32>
    %42 = arith.mulf %41, %40 : vector<2x1xf32>
    %43 = arith.divf %13, %34 : vector<2x1xf32>
    %cst_24 = arith.constant 0.000000e+00 : f32
    %44 = vector.broadcast %cst_24 : f32 to vector<2x1xf32>
    %45 = arith.subf %44, %42 : vector<2x1xf32>
    %46 = math.exp %45 : vector<2x1xf32>
    %47 = arith.mulf %43, %46 : vector<2x1xf32>
    %48 = tpu.iota {dimensions = array<i32: 1>} : vector<2x128xi32>
    %c0_i32 = arith.constant 0 : i32
    %49 = vector.broadcast %c0_i32 : i32 to vector<2x128xi32>
    %50 = arith.cmpi eq, %48, %49 : vector<2x128xi32>
    %cst_25 = arith.constant 0.000000e+00 : f32
    %51 = vector.shape_cast %47 : vector<2x1xf32> to vector<2x1xf32>
    %52 = vector.broadcast %51 : vector<2x1xf32> to vector<2x128xf32>
    %53 = vector.broadcast %cst_25 : f32 to vector<2x128xf32>
    %54 = arith.select %50, %52, %53 : vector<2x128xi1>, vector<2x128xf32>
    %c1_i32 = arith.constant 1 : i32
    %55 = vector.broadcast %c1_i32 : i32 to vector<2x128xi32>
    %56 = arith.cmpi eq, %48, %55 : vector<2x128xi32>
    %cst_26 = arith.constant 0.000000e+00 : f32
    %57 = vector.shape_cast %13 : vector<2x1xf32> to vector<2x1xf32>
    %58 = vector.broadcast %57 : vector<2x1xf32> to vector<2x128xf32>
    %59 = vector.broadcast %cst_26 : f32 to vector<2x128xf32>
    %60 = arith.select %56, %58, %59 : vector<2x128xi1>, vector<2x128xf32>
    %61 = arith.addf %54, %60 : vector<2x128xf32>
    %c2_i32 = arith.constant 2 : i32
    %62 = vector.broadcast %c2_i32 : i32 to vector<2x128xi32>
    %63 = arith.cmpi eq, %48, %62 : vector<2x128xi32>
    %cst_27 = arith.constant 0.000000e+00 : f32
    %64 = vector.shape_cast %34 : vector<2x1xf32> to vector<2x1xf32>
    %65 = vector.broadcast %64 : vector<2x1xf32> to vector<2x128xf32>
    %66 = vector.broadcast %cst_27 : f32 to vector<2x128xf32>
    %67 = arith.select %63, %65, %66 : vector<2x128xi1>, vector<2x128xf32>
    %68 = arith.addf %61, %67 : vector<2x128xf32>
    %c3_i32 = arith.constant 3 : i32
    %69 = vector.broadcast %c3_i32 : i32 to vector<2x128xi32>
    %70 = arith.cmpi eq, %48, %69 : vector<2x128xi32>
    %cst_28 = arith.constant 0.000000e+00 : f32
    %71 = vector.shape_cast %42 : vector<2x1xf32> to vector<2x1xf32>
    %72 = vector.broadcast %71 : vector<2x1xf32> to vector<2x128xf32>
    %73 = vector.broadcast %cst_28 : f32 to vector<2x128xf32>
    %74 = arith.select %70, %72, %73 : vector<2x128xi1>, vector<2x128xf32>
    %75 = arith.addf %68, %74 : vector<2x128xf32>
    %c0_29 = arith.constant 0 : index
    %c0_30 = arith.constant 0 : index
    %76 = vector.load %arg5[%c0_29, %c0_30] : memref<2x128xf32, #tpu.memory_space<vmem>>, vector<2x128xf32>
    tpu.vector_store %arg5[%c0_29, %c0_30], %75 {strides = array<i32>} : memref<2x128xf32, #tpu.memory_space<vmem>>, vector<2x128xf32>,
    return
  }
  func.func @transform_0(%arg0: i32) -> (i32, i32, i32) {
    %c0_i32 = arith.constant 0 : i32
    %c0_i32_0 = arith.constant 0 : i32
    %c0_i32_1 = arith.constant 0 : i32
    return %arg0, %c0_i32, %c0_i32_0 : i32, i32, i32
  }
  func.func @transform_1(%arg0: i32) -> (i32, i32, i32) {
    %c0_i32 = arith.constant 0 : i32
    %c0_i32_0 = arith.constant 0 : i32
    %c0_i32_1 = arith.constant 0 : i32
    return %arg0, %c0_i32, %c0_i32_0 : i32, i32, i32
  }
  func.func @transform_2(%arg0: i32) -> (i32, i32, i32) {
    %c0_i32 = arith.constant 0 : i32
    %c0_i32_0 = arith.constant 0 : i32
    %c0_i32_1 = arith.constant 0 : i32
    return %arg0, %c0_i32, %c0_i32_0 : i32, i32, i32
  }
  func.func @transform_3(%arg0: i32) -> (i32, i32, i32) {
    %c0_i32 = arith.constant 0 : i32
    %c0_i32_0 = arith.constant 0 : i32
    %c0_i32_1 = arith.constant 0 : i32
    return %arg0, %c0_i32, %c0_i32_0 : i32, i32, i32
  }
  func.func @transform_4(%arg0: i32) -> (i32, i32) {
    %c0_i32 = arith.constant 0 : i32
    %c0_i32_0 = arith.constant 0 : i32
    return %arg0, %c0_i32 : i32, i32
  }
}

</mosaic_0001>

<bundles_post_ra>
// kernel: custom-call
= control target key start
LH: loop header
LB: loop body
LE: loop exit
PB: predicated region body
PF: predicated region fallthrough
CT: control target
= control target key end

     0   :  { %2 = vsyncpa [#allocation0], 0  ;;  %s58_s0 = inlined_call_operand.vmem [shape: c64[2,8256], index: 0, kind: input, shape index: {}]   ;;  %s59_s1 = inlined_call_operand.hbm [shape: f32[2,8256], index: 1, kind: output, shape index: {}]  }
   0x1   :  { %s3_s8 = sshll.u32 %s58_s0, 4  ;;  %s4_s8 = int_to_ptr.vmem [resolvable:$true] %s3_s8 }
   0x2   :  { %s9_s9 = scalar_lea.vmem %s4_s8, 132096  ;;  %s13_s10 = scalar_lea.vmem %s4_s8, 264192 }
   0x3   :  { %p10_p0 = scmp.ne.s32.totalorder %s4_s8, %s9_s9  ;;  %p14_p1 = scmp.lt.s32.totalorder %s4_s8, %s4_s8 }
   0x4   :  { %p15_p2 = scmp.lt.s32.totalorder %s13_s10, %s9_s9 }
   0x6   :  { %p16_p3 = por %p15_p2, %p14_p1 }
   0x8   :  { %p17_p4 = pnand %p16_p3, %p10_p0 }
   0xa   :  { %20 = shalt.err (!%p17_p4)  }
   0xb   :  { %s21_s13 = scalar_lea.hbm %s59_s1, 132096 }
   0xc   :  { %p22_p5 = scmp.ne.s32.totalorder %s59_s1, %s21_s13  ;;  %p25_p6 = scmp.lt.u32.totalorder %s21_s13, %s59_s1 }
   0xe   :  { %p27_p7 = pnand %p25_p6, %p22_p5 }
  0x10   :  { %30 = shalt.err (!%p27_p7)  }
  0x11   :  { %6 = dma.vmem_to_hbm [thread:$0]  %s4_s8, 132096, %s59_s1, [#allocation0] }
  0x12   :  { %31 = dma.done.wait [#allocation0], 132096  }
  0x13   :  { %32 = vsyncadd [#allocation0], 4294835200 }
  0x14   :  { %8 = vsyncpa [#allocation0], 1 }

// kernel: custom-call.1
= control target key start
LH: loop header
LB: loop body
LE: loop exit
PB: predicated region body
PF: predicated region fallthrough
CT: control target
= control target key end

     0   :  { %s62_s0 = inlined_call_operand.vmem [shape: c64[2,8256], index: 0, kind: input, shape index: {}]   ;;  %s63_s1 = inlined_call_operand.hbm [shape: f32[2,8256], index: 1, kind: output, shape index: {}]  }
   0x1   :  { %s2_s8 = scalar_lea.vmem %s62_s0, 8256 }
   0x2   :  { %3 = vsyncpa [#allocation0], 0  ;;  %s4_s9 = sshll.u32 %s2_s8, 4  ;;  %s12_s13 = sshll.u32 %s62_s0, 4  ;;  %s5_s9 = int_to_ptr.vmem [resolvable:$true] %s4_s9  ;;  %s13_s13 = int_to_ptr.vmem [resolvable:$false] %s12_s13 }
   0x3   :  { %s10_s10 = scalar_lea.vmem %s5_s9, 132096  ;;  %s14_s14 = scalar_lea.vmem %s13_s13, 264192 }
   0x4   :  { %p11_p0 = scmp.ne.s32.totalorder %s5_s9, %s10_s10  ;;  %p15_p1 = scmp.lt.s32.totalorder %s5_s9, %s13_s13 }
   0x5   :  { %p16_p2 = scmp.lt.s32.totalorder %s14_s14, %s10_s10 }
   0x7   :  { %p17_p3 = por %p16_p2, %p15_p1 }
   0x9   :  { %p18_p4 = pnand %p17_p3, %p11_p0 }
   0xb   :  { %21 = shalt.err (!%p18_p4)  }
   0xc   :  { %s22_s17 = scalar_lea.hbm %s63_s1, 132096 }
   0xd   :  { %p23_p5 = scmp.ne.s32.totalorder %s63_s1, %s22_s17  ;;  %p26_p6 = scmp.lt.u32.totalorder %s22_s17, %s63_s1 }
   0xf   :  { %p28_p7 = pnand %p26_p6, %p23_p5 }
  0x11   :  { %31 = shalt.err (!%p28_p7)  }
  0x12   :  { %7 = dma.vmem_to_hbm [thread:$0]  %s5_s9, 132096, %s63_s1, [#allocation0] }
  0x13   :  { %32 = dma.done.wait [#allocation0], 132096  }
  0x14   :  { %33 = vsyncadd [#allocation0], 4294835200 }
  0x15   :  { %9 = vsyncpa [#allocation0], 1 }

// kernel: custom-call.3
= control target key start
LH: loop header
LB: loop body
LE: loop exit
PB: predicated region body
PF: predicated region fallthrough
CT: control target
= control target key end

     0   :  { %s59_s0 = inlined_call_operand.hbm [shape: c64[2,2,8,8], index: 0, kind: input, shape index: {}]   ;;  %s60_s1 = inlined_call_operand.vmem [shape: f32[2,2,8,8], index: 1, kind: output, shape index: {}]  }
   0x1   :  { %s2_s8 = scalar_lea.hbm %s59_s0, 512 }
   0x2   :  { %3 = vsyncpa [#allocation0], 0  ;;  %s4_s11 = sshll.u32 %s60_s1, 4  ;;  %s34_s14 = scalar_lea.hbm %s59_s0, 1024  ;;  %s5_s11 = int_to_ptr.vmem [resolvable:$true] %s4_s11 }
   0x3   :  { %p11_p0 = scmp.ne.s32.totalorder %s2_s8, %s34_s14  ;;  %p13_p1 = scmp.lt.u32.totalorder %s2_s8, %s59_s0 }
   0x4   :  { %p14_p2 = scmp.lt.u32.totalorder %s34_s14, %s34_s14  ;;  %p16_p4 = scmp.lt.u32.totalorder %s34_s14, %s2_s8 }
   0x6   :  { %p15_p3 = por %p14_p2, %p13_p1 }
   0x8   :  { %p17_p5 = por %p16_p4, %p15_p3 }
   0xa   :  { %p18_p6 = pnand %p17_p5, %p11_p0 }
   0xc   :  { %21 = shalt.err (!%p18_p6)  }
   0xd   :  { %s22_s17 = scalar_lea.vmem %s5_s11, 512  ;;  %p27_p8 = scmp.lt.s32.totalorder %s5_s11, %s5_s11 }
   0xe   :  { %p23_p7 = scmp.ne.s32.totalorder %s5_s11, %s22_s17  ;;  %p28_p9 = scmp.lt.s32.totalorder %s22_s17, %s22_s17 }
  0x10   :  { %p29_p10 = por %p28_p9, %p27_p8 }
  0x12   :  { %p30_p11 = pnand %p29_p10, %p23_p7 }
  0x14   :  { %33 = shalt.err (!%p30_p11)  }
  0x15   :  { %7 = dma.hbm_to_vmem [thread:$0]  %s2_s8, 512, %s5_s11, [#allocation0] }
  0x16   :  { %35 = dma.done.wait [#allocation0], 512  }
  0x17   :  { %36 = vsyncadd [#allocation0], 4294966784 }
  0x18   :  { %9 = vsyncpa [#allocation0], 1 }

// kernel: custom-call.2
= control target key start
LH: loop header
LB: loop body
LE: loop exit
PB: predicated region body
PF: predicated region fallthrough
CT: control target
= control target key end

     0   :  { %2 = vsyncpa [#allocation0], 0  ;;  %s61_s0 = inlined_call_operand.hbm [shape: c64[2,2,8,8], index: 0, kind: input, shape index: {}]   ;;  %s62_s1 = inlined_call_operand.vmem [shape: f32[2,2,8,8], index: 1, kind: output, shape index: {}]  }
   0x1   :  { %s3_s8 = sshll.u32 %s62_s1, 4  ;;  %s9_s11 = scalar_lea.hbm %s61_s0, 512  ;;  %s4_s8 = int_to_ptr.vmem [resolvable:$true] %s3_s8 }
   0x2   :  { %p10_p0 = scmp.ne.s32.totalorder %s61_s0, %s9_s11  ;;  %s11_s16 = scalar_lea.hbm %s61_s0, 1024 }
   0x3   :  { %p12_p1 = scmp.lt.u32.totalorder %s11_s16, %s9_s11  ;;  %p13_p2 = scmp.lt.u32.totalorder %s9_s11, %s61_s0 }
   0x5   :  { %p14_p3 = por %p13_p2, %p12_p1 }
   0x7   :  { %p15_p4 = pnand %p14_p3, %p10_p0 }
   0x9   :  { %18 = shalt.err (!%p15_p4)  }
   0xa   :  { %s19_s1 = scalar_lea.vmem %s4_s8, 512  ;;  %p24_p6 = scmp.lt.s32.totalorder %s4_s8, %s4_s8 }
   0xb   :  { %p20_p5 = scmp.ne.s32.totalorder %s4_s8, %s19_s1  ;;  %p25_p7 = scmp.lt.s32.totalorder %s19_s1, %s19_s1 }
   0xd   :  { %p26_p8 = por %p25_p7, %p24_p6 }
   0xf   :  { %p27_p9 = pnand %p26_p8, %p20_p5 }
  0x11   :  { %30 = shalt.err (!%p27_p9)  }
  0x12   :  { %6 = dma.hbm_to_vmem [thread:$0]  %s61_s0, 512, %s4_s8, [#allocation0] }
  0x13   :  { %31 = dma.done.wait [#allocation0], 512  }
  0x14   :  { %32 = vsyncadd [#allocation0], 4294966784 }
  0x15   :  { %8 = vsyncpa [#allocation0], 1 }

// kernel: _lambda_.1
= control target key start
LH: loop header
LB: loop body
LE: loop exit
PB: predicated region body
PF: predicated region fallthrough
CT: control target
= control target key end

     0   :  { %s4131_s1 = inlined_call_operand.vmem [shape: f32[2,128,128], index: 1, kind: input, shape index: {}]   ;;  %s4132_s0 = inlined_call_operand.vmem [shape: f32[2,128,128], index: 0, kind: input, shape index: {}]   ;;  %s4133_s2 = inlined_call_operand.vmem [shape: f32[2,128,128], index: 2, kind: input, shape index: {}]   ;;  %s4134_s3 = inlined_call_operand.vmem [shape: f32[2,128,128], index: 3, kind: input, shape index: {}]   ;;  %s4135_s4 = inlined_call_operand.vmem [shape: f32[2,128], index: 4, kind: output, shape index: {}]  }
   0x1   :  { %v2538_v0 = vld [vmem:[%s4131_s1] sm:$0xff]  ;;  %v2543_v1 = vld [vmem:[%s4131_s1 + $0x8] sm:$0xff]  ;;  %v2562_v5 = vld [vmem:[%s4131_s1 + $0x10] sm:$0xff] }
   0x2   :  { %v2548_v2 = vld [vmem:[%s4131_s1 + $0x80] sm:$0xff]  ;;  %v2552_v3 = vpack.c.bf16 %v2543_v1, %v2538_v0  ;;  %v2557_v4 = vld [vmem:[%s4131_s1 + $0x88] sm:$0xff]  ;;  %v2567_v6 = vld [vmem:[%s4131_s1 + $0x18] sm:$0xff]  ;;  %1962 = vmatprep.mubr.f32.mxu0 %v2538_v0 }
   0x3   :  { %2018 = vmatprep.mubr.f32.mxu1 %v2548_v2  ;;  %v2573_v7 = vpack.c.bf16 %v2557_v4, %v2548_v2  ;;  %v2577_v8 = vpack.c.bf16 %v2567_v6, %v2562_v5  ;;  %v2582_v9 = vld [vmem:[%s4131_s1 + $0x90] sm:$0xff]  ;;  %v2587_v10 = vld [vmem:[%s4131_s1 + $0x98] sm:$0xff]  ;;  %v2602_v12 = vld [vmem:[%s4131_s1 + $0x20] sm:$0xff] }
   0x4   :  { %2267 = vmatprep.subr.bf16.mxu0 %v2552_v3  ;;  %v2592_v11 = vpack.c.bf16 %v2587_v10, %v2582_v9  ;;  %4157 = vst [vmem:[#allocation2_spill] sm:$0xff] %v2602_v12  ;;  %v2607_v13 = vld [vmem:[%s4131_s1 + $0x28] sm:$0xff]  ;;  %v2612_v14 = vld [vmem:[%s4131_s1 + $0xa0] sm:$0xff]  ;;  %v2634_v18 = vld [vmem:[%s4131_s1 + $0x30] sm:$0xff] }
   0x5   :  { %2299 = vmatprep.subr.bf16.mxu1 %v2573_v7  ;;  %2269 = vmatpush3.bf16.xpose.msra.mxu0 %v2552_v3  ;;  %4158 = vst [vmem:[#allocation3_spill] sm:$0xff] %v2612_v14  ;;  %v2617_v15 = vld [vmem:[%s4131_s1 + $0xa8] sm:$0xff]  ;;  %v2621_v16 = vpack.c.bf16 %v2607_v13, %v2602_v12  ;;  %4160 = vst [vmem:[#allocation5_spill] sm:$0xff] %v2634_v18  ;;  %v2639_v19 = vld [vmem:[%s4131_s1 + $0x38] sm:$0xff] }
   0x6   :  { %2301 = vmatpush3.bf16.xpose.msra.mxu1 %v2573_v7  ;;  %2271 = vmatprep.subr.bf16.mxu0 %v2577_v8  ;;  %4159 = vst [vmem:[#allocation4_spill] sm:$0xff] %v2617_v15  ;;  %v2625_v17 = vpack.c.bf16 %v2617_v15, %v2612_v14  ;;  %v2644_v20 = vld [vmem:[%s4131_s1 + $0xb0] sm:$0xff]  ;;  %v2649_v21 = vld [vmem:[%s4131_s1 + $0xb8] sm:$0xff]  ;;  %v2653_v22 = vpack.c.bf16 %v2639_v19, %v2634_v18  ;;  %v2666_v24 = vld [vmem:[%s4131_s1 + $0x40] sm:$0xff] }
   0x7   :  { %2303 = vmatprep.subr.bf16.mxu1 %v2592_v11  ;;  %v2657_v23 = vpack.c.bf16 %v2649_v21, %v2644_v20  ;;  %4161 = vst [vmem:[#allocation6_spill] sm:$0xff] %v2666_v24  ;;  %v2671_v25 = vld [vmem:[%s4131_s1 + $0x48] sm:$0xff]  ;;  %v2676_v26 = vld [vmem:[%s4131_s1 + $0xc0] sm:$0xff]  ;;  %v2698_v30 = vld [vmem:[%s4131_s1 + $0x50] sm:$0xff] }
   0x8   :  { %4162 = vst [vmem:[#allocation7_spill] sm:$0xff] %v2671_v25  ;;  %4163 = vst [vmem:[#allocation8_spill] sm:$0xff] %v2676_v26  ;;  %v2681_v27 = vld [vmem:[%s4131_s1 + $0xc8] sm:$0xff]  ;;  %v2685_v28 = vpack.c.bf16 %v2671_v25, %v2666_v24  ;;  %v2703_v31 = vld [vmem:[%s4131_s1 + $0x58] sm:$0xff] }
   0x9   :  { %4164 = vst [vmem:[#allocation9_spill] sm:$0xff] %v2681_v27  ;;  %v2689_v29 = vpack.c.bf16 %v2681_v27, %v2676_v26  ;;  %4165 = vst [vmem:[#allocation10_spill] sm:$0xff] %v2698_v30  ;;  %v2708_v32 = vld [vmem:[%s4131_s1 + $0xd0] sm:$0xff]  ;;  %v2713_v33 = vld [vmem:[%s4131_s1 + $0xd8] sm:$0xff]  ;;  %v2717_v34 = vpack.c.bf16 %v2703_v31, %v2698_v30 }
   0xa   :  { %4166 = vst [vmem:[#allocation11_spill] sm:$0xff] %v2703_v31  ;;  %4167 = vst [vmem:[#allocation12_spill] sm:$0xff] %v2708_v32  ;;  %v2721_v35 = vpack.c.bf16 %v2713_v33, %v2708_v32  ;;  %v2730_v36 = vld [vmem:[%s4131_s1 + $0x60] sm:$0xff]  ;;  %v2735_v37 = vld [vmem:[%s4131_s1 + $0x68] sm:$0xff] }
   0xb   :  { %4168 = vst [vmem:[#allocation13_spill] sm:$0xff] %v2713_v33  ;;  %v2740_v38 = vld [vmem:[%s4131_s1 + $0xe0] sm:$0xff]  ;;  %v2745_v39 = vld [vmem:[%s4131_s1 + $0xe8] sm:$0xff]  ;;  %v2749_v40 = vpack.c.bf16 %v2735_v37, %v2730_v36  ;;  %v2762_v42 = vld [vmem:[%s4131_s1 + $0x70] sm:$0xff] }
   0xc   :  { %v2753_v41 = vpack.c.bf16 %v2745_v39, %v2740_v38  ;;  %v2767_v43 = vld [vmem:[%s4131_s1 + $0x78] sm:$0xff]  ;;  %v2772_v44 = vld [vmem:[%s4131_s1 + $0xf0] sm:$0xff]  ;;  %v2794_v48 = vld [vmem:[%s4132_s0] sm:$0xff] }
   0xd   :  { %2273 = vmatpush3.bf16.xpose.msra.mxu0 %v2577_v8  ;;  %v2777_v45 = vld [vmem:[%s4131_s1 + $0xf8] sm:$0xff]  ;;  %v2781_v46 = vpack.c.bf16 %v2767_v43, %v2762_v42  ;;  %v2799_v49 = vld [vmem:[%s4132_s0 + $0x8] sm:$0xff]  ;;  %v2804_v50 = vld [vmem:[%s4132_s0 + $0x80] sm:$0xff] }
   0xe   :  { %2305 = vmatpush3.bf16.xpose.msra.mxu1 %v2592_v11  ;;  %2275 = vmatprep.subr.bf16.mxu0 %v2621_v16  ;;  %v2785_v47 = vpack.c.bf16 %v2777_v45, %v2772_v44  ;;  %v2809_v51 = vld [vmem:[%s4132_s0 + $0x88] sm:$0xff]  ;;  %v2330_v52 = vpack.c.bf16 %v2799_v49, %v2794_v48  ;;  %v2820_v54 = vld [vmem:[%s4132_s0 + $0x10] sm:$0xff]  ;;  %v2825_v55 = vld [vmem:[%s4132_s0 + $0x18] sm:$0xff] }
   0xf   :  { %2307 = vmatprep.subr.bf16.mxu1 %v2625_v17  ;;  %v2362_v53 = vpack.c.bf16 %v2809_v51, %v2804_v50  ;;  %v2830_v56 = vld [vmem:[%s4132_s0 + $0x90] sm:$0xff]  ;;  %v2835_v57 = vld [vmem:[%s4132_s0 + $0x98] sm:$0xff]  ;;  %v2334_v58 = vpack.c.bf16 %v2825_v55, %v2820_v54  ;;  %v2846_v60 = vld [vmem:[%s4132_s0 + $0x20] sm:$0xff] }
  0x10   :  { %v2366_v59 = vpack.c.bf16 %v2835_v57, %v2830_v56  ;;  %v2851_v61 = vld [vmem:[%s4132_s0 + $0x28] sm:$0xff]  ;;  %v2857_v62 = vld [vmem:[%s4132_s0 + $0xa0] sm:$0xff] }
  0x11   :  { %v2862_v63 = vld [vmem:[%s4132_s0 + $0xa8] sm:$0xff] }
  0x15   :  { %2277 = vmatpush3.bf16.xpose.msra.mxu0 %v2621_v16 }
  0x16   :  { %2309 = vmatpush3.bf16.xpose.msra.mxu1 %v2625_v17  ;;  %2279 = vmatprep.subr.bf16.mxu0 %v2653_v22 }
  0x17   :  { %2311 = vmatprep.subr.bf16.mxu1 %v2657_v23 }
  0x1d   :  { %2281 = vmatpush3.bf16.xpose.msra.mxu0 %v2653_v22 }
  0x1e   :  { %2313 = vmatpush3.bf16.xpose.msra.mxu1 %v2657_v23  ;;  %2283 = vmatprep.subr.bf16.mxu0 %v2685_v28 }
  0x1f   :  { %2315 = vmatprep.subr.bf16.mxu1 %v2689_v29 }
  0x25   :  { %2285 = vmatpush3.bf16.xpose.msra.mxu0 %v2685_v28 }
  0x26   :  { %2317 = vmatpush3.bf16.xpose.msra.mxu1 %v2689_v29  ;;  %2287 = vmatprep.subr.bf16.mxu0 %v2717_v34 }
  0x27   :  { %2319 = vmatprep.subr.bf16.mxu1 %v2721_v35 }
  0x2d   :  { %2289 = vmatpush3.bf16.xpose.msra.mxu0 %v2717_v34 }
  0x2e   :  { %2321 = vmatpush3.bf16.xpose.msra.mxu1 %v2721_v35  ;;  %2291 = vmatprep.subr.bf16.mxu0 %v2749_v40 }
  0x2f   :  { %2323 = vmatprep.subr.bf16.mxu1 %v2753_v41 }
  0x35   :  { %2293 = vmatpush3.bf16.xpose.msra.mxu0 %v2749_v40 }
  0x36   :  { %2325 = vmatpush3.bf16.xpose.msra.mxu1 %v2753_v41  ;;  %2295 = vmatprep.subr.bf16.mxu0 %v2781_v46 }
  0x37   :  { %2327 = vmatprep.subr.bf16.mxu1 %v2785_v47 }
  0x3d   :  { %2297 = vmatpush3.bf16.xpose.msra.mxu0 %v2781_v46 }
  0x3e   :  { %2329 = vmatpush3.bf16.xpose.msra.mxu1 %v2785_v47  ;;  %2331 = vmatprep.subr.bf16.mxu0 %v2330_v52 }
  0x3f   :  { %2363 = vmatprep.subr.bf16.mxu1 %v2362_v53 }
  0x44   :  { %1963 = vmatmul.mubr.f32.vlgmr.msra.gmra.mrb[0].mxu0 %v2543_v1 }
  0x45   :  { %2019 = vmatmul.mubr.f32.vlgmr.msra.gmra.mrb[0].mxu1 %v2557_v4  ;;  %2333 = vmatpush3.bf16.xpose.msra.mxu0 %v2330_v52  ;;  %v2338_v52 = vpack.c.bf16 %v2851_v61, %v2846_v60 }
  0x46   :  { %2365 = vmatpush3.bf16.xpose.msra.mxu1 %v2362_v53  ;;  %2335 = vmatprep.subr.bf16.mxu0 %v2334_v58  ;;  %v2370_v53 = vpack.c.bf16 %v2862_v63, %v2857_v62 }
  0x47   :  { %2367 = vmatprep.subr.bf16.mxu1 %v2366_v59  ;;  %1965 = vmatprep.mubr.f32.mxu0 %v2562_v5 }
  0x48   :  { %2021 = vmatprep.mubr.f32.mxu1 %v2582_v9  ;;  %1966 = vmatmul.mubr.f32.gmra.mrb[2].mxu0 %v2567_v6 }
  0x49   :  { %2022 = vmatmul.mubr.f32.gmra.mrb[2].mxu1 %v2587_v10  ;;  %1968 = vmatprep.mubr.f32.mxu0 %v2602_v12  ;;  %v2878_v12 = vld [vmem:[%s4132_s0 + $0x30] sm:$0xff] }
  0x4a   :  { %2024 = vmatprep.mubr.f32.mxu1 %v2612_v14  ;;  %v2883_v14 = vld [vmem:[%s4132_s0 + $0x38] sm:$0xff] }
  0x4c   :  { %1969 = vmatmul.mubr.f32.gmra.mrb[4].mxu0 %v2607_v13 }
  0x4d   :  { %2337 = vmatpush3.bf16.xpose.msra.mxu0 %v2334_v58  ;;  %2025 = vmatmul.mubr.f32.gmra.mrb[4].mxu1 %v2617_v15  ;;  %v2889_v58 = vld [vmem:[%s4132_s0 + $0xb0] sm:$0xff] }
  0x4e   :  { %2369 = vmatpush3.bf16.xpose.msra.mxu1 %v2366_v59  ;;  %2339 = vmatprep.subr.bf16.mxu0 %v2338_v52  ;;  %v2894_v59 = vld [vmem:[%s4132_s0 + $0xb8] sm:$0xff] }
  0x4f   :  { %2371 = vmatprep.subr.bf16.mxu1 %v2370_v53  ;;  %1971 = vmatprep.mubr.f32.mxu0 %v2634_v18  ;;  %v2342_v18 = vpack.c.bf16 %v2883_v14, %v2878_v12  ;;  %v2374_v15 = vpack.c.bf16 %v2894_v59, %v2889_v58 }
  0x50   :  { %2027 = vmatprep.mubr.f32.mxu1 %v2644_v20  ;;  %1972 = vmatmul.mubr.f32.gmra.mrb[6].mxu0 %v2639_v19 }
  0x51   :  { %2028 = vmatmul.mubr.f32.gmra.mrb[6].mxu1 %v2649_v21  ;;  %1974 = vmatprep.mubr.f32.mxu0 %v2666_v24  ;;  %v2910_v24 = vld [vmem:[%s4132_s0 + $0x40] sm:$0xff] }
  0x52   :  { %2030 = vmatprep.mubr.f32.mxu1 %v2676_v26  ;;  %v2915_v26 = vld [vmem:[%s4132_s0 + $0x48] sm:$0xff] }
  0x54   :  { %1975 = vmatmul.mubr.f32.gmra.mrb[8].mxu0 %v2671_v25 }
  0x55   :  { %2341 = vmatpush3.bf16.xpose.msra.mxu0 %v2338_v52  ;;  %2031 = vmatmul.mubr.f32.gmra.mrb[8].mxu1 %v2681_v27  ;;  %v2921_v52 = vld [vmem:[%s4132_s0 + $0xc0] sm:$0xff] }
  0x56   :  { %2373 = vmatpush3.bf16.xpose.msra.mxu1 %v2370_v53  ;;  %2343 = vmatprep.subr.bf16.mxu0 %v2342_v18  ;;  %v2926_v53 = vld [vmem:[%s4132_s0 + $0xc8] sm:$0xff] }
  0x57   :  { %2375 = vmatprep.subr.bf16.mxu1 %v2374_v15  ;;  %1977 = vmatprep.mubr.f32.mxu0 %v2698_v30  ;;  %v2346_v30 = vpack.c.bf16 %v2915_v26, %v2910_v24  ;;  %v2378_v27 = vpack.c.bf16 %v2926_v53, %v2921_v52 }
  0x58   :  { %2033 = vmatprep.mubr.f32.mxu1 %v2708_v32  ;;  %1978 = vmatmul.mubr.f32.gmra.mrb[10].mxu0 %v2703_v31  ;;  %v2996_v32 = vld [vmem:[%s4132_s0 + $0x70] sm:$0xff] }
  0x59   :  { %2034 = vmatmul.mubr.f32.gmra.mrb[10].mxu1 %v2713_v33  ;;  %1980 = vmatprep.mubr.f32.mxu0 %v2730_v36  ;;  %v2942_v36 = vld [vmem:[%s4132_s0 + $0x50] sm:$0xff]  ;;  %v3001_v33 = vld [vmem:[%s4132_s0 + $0x78] sm:$0xff] }
  0x5a   :  { %2036 = vmatprep.mubr.f32.mxu1 %v2740_v38  ;;  %v2947_v38 = vld [vmem:[%s4132_s0 + $0x58] sm:$0xff]  ;;  %v3006_v31 = vld [vmem:[%s4132_s0 + $0xf0] sm:$0xff] }
  0x5c   :  { %1981 = vmatmul.mubr.f32.gmra.mrb[12].mxu0 %v2735_v37  ;;  %v2350_v37 = vpack.c.bf16 %v2947_v38, %v2942_v36 }
  0x5d   :  { %2345 = vmatpush3.bf16.xpose.msra.mxu0 %v2342_v18  ;;  %2037 = vmatmul.mubr.f32.gmra.mrb[12].mxu1 %v2745_v39  ;;  %v2953_v18 = vld [vmem:[%s4132_s0 + $0xd0] sm:$0xff] }
  0x5e   :  { %2377 = vmatpush3.bf16.xpose.msra.mxu1 %v2374_v15  ;;  %2347 = vmatprep.subr.bf16.mxu0 %v2346_v30  ;;  %v2958_v15 = vld [vmem:[%s4132_s0 + $0xd8] sm:$0xff] }
  0x5f   :  { %2379 = vmatprep.subr.bf16.mxu1 %v2378_v27  ;;  %1983 = vmatprep.mubr.f32.mxu0 %v2762_v42  ;;  %v2382_v39 = vpack.c.bf16 %v2958_v15, %v2953_v18  ;;  %v2972_v42 = vld [vmem:[%s4132_s0 + $0x60] sm:$0xff] }
  0x60   :  { %2039 = vmatprep.mubr.f32.mxu1 %v2772_v44  ;;  %1984 = vmatmul.mubr.f32.gmra.mrb[14].mxu0 %v2767_v43  ;;  %4169 = vst [vmem:[#allocation14_spill] sm:$0xff] %v2972_v42  ;;  %v2977_v43 = vld [vmem:[%s4132_s0 + $0x68] sm:$0xff]  ;;  %v2982_v44 = vld [vmem:[%s4132_s0 + $0xe0] sm:$0xff] }
  0x61   :  { %2040 = vmatmul.mubr.f32.gmra.mrb[14].mxu1 %v2777_v45  ;;  %2074 = vmatprep.mubr.f32.mxu0 %v2794_v48  ;;  %4170 = vst [vmem:[#allocation15_spill] sm:$0xff] %v2977_v43  ;;  %4171 = vst [vmem:[#allocation16_spill] sm:$0xff] %v2982_v44 }
  0x62   :  { %2130 = vmatprep.mubr.f32.mxu1 %v2804_v50 }
  0x65   :  { %2349 = vmatpush3.bf16.xpose.msra.mxu0 %v2346_v30  ;;  %v2354_v30 = vpack.c.bf16 %v2977_v43, %v2972_v42 }
  0x66   :  { %2381 = vmatpush3.bf16.xpose.msra.mxu1 %v2378_v27  ;;  %2351 = vmatprep.subr.bf16.mxu0 %v2350_v37  ;;  %v2987_v27 = vld [vmem:[%s4132_s0 + $0xe8] sm:$0xff] }
  0x67   :  { %2383 = vmatprep.subr.bf16.mxu1 %v2382_v39  ;;  %4172 = vst [vmem:[#allocation17_spill] sm:$0xff] %v2987_v27  ;;  %v2386_v45 = vpack.c.bf16 %v2987_v27, %v2982_v44 }
  0x6d   :  { %2353 = vmatpush3.bf16.xpose.msra.mxu0 %v2350_v37  ;;  %v3011_v37 = vld [vmem:[%s4132_s0 + $0xf8] sm:$0xff] }
  0x6e   :  { %2385 = vmatpush3.bf16.xpose.msra.mxu1 %v2382_v39  ;;  %2355 = vmatprep.subr.bf16.mxu0 %v2354_v30  ;;  %v2358_v39 = vpack.c.bf16 %v3001_v33, %v2996_v32  ;;  %v2390_v25 = vpack.c.bf16 %v3011_v37, %v3006_v31 }
  0x6f   :  { %2387 = vmatprep.subr.bf16.mxu1 %v2386_v45 }
  0x75   :  { %2357 = vmatpush3.bf16.xpose.msra.mxu0 %v2354_v30 }
  0x76   :  { %2389 = vmatpush3.bf16.xpose.msra.mxu1 %v2386_v45  ;;  %2359 = vmatprep.subr.bf16.mxu0 %v2358_v39 }
  0x77   :  { %2391 = vmatprep.subr.bf16.mxu1 %v2390_v25 }
  0x7d   :  { %2361 = vmatpush3.bf16.xpose.msra.mxu0 %v2358_v39 }
  0x7e   :  { %2393 = vmatpush3.bf16.xpose.msra.mxu1 %v2390_v25  ;;  %2395 = vmatprep.subr.bf16.mxu0 %v2552_v3 }
  0x7f   :  { %2427 = vmatprep.subr.bf16.mxu1 %v2573_v7 }
  0x84   :  { %2075 = vmatmul.mubr.f32.vlgmr.msra.gmra.mrb[0].mxu0 %v2799_v49 }
  0x85   :  { %2131 = vmatmul.mubr.f32.vlgmr.msra.gmra.mrb[0].mxu1 %v2809_v51  ;;  %2397 = vmatpush3.bf16.xpose.msra.mxu0 %v2552_v3 }
  0x86   :  { %2429 = vmatpush3.bf16.xpose.msra.mxu1 %v2573_v7  ;;  %2077 = vmatprep.mubr.f32.mxu0 %v2820_v54 }
  0x87   :  { %2133 = vmatprep.mubr.f32.mxu1 %v2830_v56  ;;  %2399 = vmatprep.subr.bf16.mxu0 %v2577_v8 }
  0x88   :  { %2078 = vmatmul.mubr.f32.gmra.mrb[2].mxu0 %v2825_v55  ;;  %2431 = vmatprep.subr.bf16.mxu1 %v2592_v11 }
  0x89   :  { %2134 = vmatmul.mubr.f32.gmra.mrb[2].mxu1 %v2835_v57  ;;  %2080 = vmatprep.mubr.f32.mxu0 %v2846_v60 }
  0x8a   :  { %2136 = vmatprep.mubr.f32.mxu1 %v2857_v62 }
  0x8c   :  { %2081 = vmatmul.mubr.f32.gmra.mrb[4].mxu0 %v2851_v61 }
  0x8d   :  { %2137 = vmatmul.mubr.f32.gmra.mrb[4].mxu1 %v2862_v63  ;;  %2401 = vmatpush3.bf16.xpose.msra.mxu0 %v2577_v8 }
  0x8e   :  { %2433 = vmatpush3.bf16.xpose.msra.mxu1 %v2592_v11  ;;  %2083 = vmatprep.mubr.f32.mxu0 %v2878_v12 }
  0x8f   :  { %2139 = vmatprep.mubr.f32.mxu1 %v2889_v58  ;;  %2403 = vmatprep.subr.bf16.mxu0 %v2621_v16 }
  0x90   :  { %2084 = vmatmul.mubr.f32.gmra.mrb[6].mxu0 %v2883_v14  ;;  %2435 = vmatprep.subr.bf16.mxu1 %v2625_v17 }
  0x91   :  { %2140 = vmatmul.mubr.f32.gmra.mrb[6].mxu1 %v2894_v59  ;;  %2086 = vmatprep.mubr.f32.mxu0 %v2910_v24 }
  0x92   :  { %2142 = vmatprep.mubr.f32.mxu1 %v2921_v52 }
  0x94   :  { %2087 = vmatmul.mubr.f32.gmra.mrb[8].mxu0 %v2915_v26 }
  0x95   :  { %2143 = vmatmul.mubr.f32.gmra.mrb[8].mxu1 %v2926_v53  ;;  %2405 = vmatpush3.bf16.xpose.msra.mxu0 %v2621_v16 }
  0x96   :  { %2437 = vmatpush3.bf16.xpose.msra.mxu1 %v2625_v17  ;;  %2089 = vmatprep.mubr.f32.mxu0 %v2942_v36 }
  0x97   :  { %2145 = vmatprep.mubr.f32.mxu1 %v2953_v18  ;;  %2407 = vmatprep.subr.bf16.mxu0 %v2653_v22 }
  0x98   :  { %2090 = vmatmul.mubr.f32.gmra.mrb[10].mxu0 %v2947_v38  ;;  %2439 = vmatprep.subr.bf16.mxu1 %v2657_v23 }
  0x99   :  { %2146 = vmatmul.mubr.f32.gmra.mrb[10].mxu1 %v2958_v15  ;;  %2092 = vmatprep.mubr.f32.mxu0 %v2972_v42 }
  0x9a   :  { %2148 = vmatprep.mubr.f32.mxu1 %v2982_v44 }
  0x9c   :  { %2093 = vmatmul.mubr.f32.gmra.mrb[12].mxu0 %v2977_v43 }
  0x9d   :  { %2149 = vmatmul.mubr.f32.gmra.mrb[12].mxu1 %v2987_v27  ;;  %2409 = vmatpush3.bf16.xpose.msra.mxu0 %v2653_v22 }
  0x9e   :  { %2441 = vmatpush3.bf16.xpose.msra.mxu1 %v2657_v23  ;;  %2095 = vmatprep.mubr.f32.mxu0 %v2996_v32 }
  0x9f   :  { %2151 = vmatprep.mubr.f32.mxu1 %v3006_v31  ;;  %2411 = vmatprep.subr.bf16.mxu0 %v2685_v28 }
  0xa0   :  { %2096 = vmatmul.mubr.f32.gmra.mrb[14].mxu0 %v3001_v33  ;;  %2443 = vmatprep.subr.bf16.mxu1 %v2689_v29 }
  0xa1   :  { %2152 = vmatmul.mubr.f32.gmra.mrb[14].mxu1 %v3011_v37  ;;  %2186 = vmatprep.mubr.f32.mxu0 %v2794_v48 }
  0xa2   :  { %2242 = vmatprep.mubr.f32.mxu1 %v2804_v50 }
  0xa5   :  { %2413 = vmatpush3.bf16.xpose.msra.mxu0 %v2685_v28 }
  0xa6   :  { %2445 = vmatpush3.bf16.xpose.msra.mxu1 %v2689_v29  ;;  %2415 = vmatprep.subr.bf16.mxu0 %v2717_v34 }
  0xa7   :  { %2447 = vmatprep.subr.bf16.mxu1 %v2721_v35 }
  0xad   :  { %2417 = vmatpush3.bf16.xpose.msra.mxu0 %v2717_v34 }
  0xae   :  { %2449 = vmatpush3.bf16.xpose.msra.mxu1 %v2721_v35  ;;  %2419 = vmatprep.subr.bf16.mxu0 %v2749_v40 }
  0xaf   :  { %2451 = vmatprep.subr.bf16.mxu1 %v2753_v41 }
  0xb5   :  { %2421 = vmatpush3.bf16.xpose.msra.mxu0 %v2749_v40 }
  0xb6   :  { %2453 = vmatpush3.bf16.xpose.msra.mxu1 %v2753_v41  ;;  %2423 = vmatprep.subr.bf16.mxu0 %v2781_v46 }
  0xb7   :  { %2455 = vmatprep.subr.bf16.mxu1 %v2785_v47 }
  0xbd   :  { %2425 = vmatpush3.bf16.xpose.msra.mxu0 %v2781_v46 }
  0xbe   :  { %2457 = vmatpush3.bf16.xpose.msra.mxu1 %v2785_v47 }
  0xc4   :  { %2187 = vmatmul.mubr.f32.vlgmr.msra.gmra.mrb[16].mxu0 %v2799_v49 }
  0xc5   :  { %2243 = vmatmul.mubr.f32.vlgmr.msra.gmra.mrb[16].mxu1 %v2809_v51  ;;  %2189 = vmatprep.mubr.f32.mxu0 %v2820_v54 }
  0xc6   :  { %2245 = vmatprep.mubr.f32.mxu1 %v2830_v56 }
  0xc8   :  { %2190 = vmatmul.mubr.f32.gmra.mrb[18].mxu0 %v2825_v55 }
  0xc9   :  { %2246 = vmatmul.mubr.f32.gmra.mrb[18].mxu1 %v2835_v57  ;;  %2192 = vmatprep.mubr.f32.mxu0 %v2846_v60 }
  0xca   :  { %2248 = vmatprep.mubr.f32.mxu1 %v2857_v62 }
  0xcc   :  { %2193 = vmatmul.mubr.f32.gmra.mrb[20].mxu0 %v2851_v61 }
  0xcd   :  { %2249 = vmatmul.mubr.f32.gmra.mrb[20].mxu1 %v2862_v63  ;;  %2195 = vmatprep.mubr.f32.mxu0 %v2878_v12 }
  0xce   :  { %2251 = vmatprep.mubr.f32.mxu1 %v2889_v58 }
  0xd0   :  { %2196 = vmatmul.mubr.f32.gmra.mrb[22].mxu0 %v2883_v14 }
  0xd1   :  { %2252 = vmatmul.mubr.f32.gmra.mrb[22].mxu1 %v2894_v59  ;;  %2198 = vmatprep.mubr.f32.mxu0 %v2910_v24 }
  0xd2   :  { %2254 = vmatprep.mubr.f32.mxu1 %v2921_v52 }
  0xd4   :  { %2199 = vmatmul.mubr.f32.gmra.mrb[24].mxu0 %v2915_v26 }
  0xd5   :  { %2255 = vmatmul.mubr.f32.gmra.mrb[24].mxu1 %v2926_v53  ;;  %2201 = vmatprep.mubr.f32.mxu0 %v2942_v36 }
  0xd6   :  { %2257 = vmatprep.mubr.f32.mxu1 %v2953_v18 }
  0xd8   :  { %2202 = vmatmul.mubr.f32.gmra.mrb[26].mxu0 %v2947_v38 }
  0xd9   :  { %2258 = vmatmul.mubr.f32.gmra.mrb[26].mxu1 %v2958_v15  ;;  %2204 = vmatprep.mubr.f32.mxu0 %v2972_v42 }
  0xda   :  { %2260 = vmatprep.mubr.f32.mxu1 %v2982_v44 }
  0xdc   :  { %2205 = vmatmul.mubr.f32.gmra.mrb[28].mxu0 %v2977_v43 }
  0xdd   :  { %2261 = vmatmul.mubr.f32.gmra.mrb[28].mxu1 %v2987_v27  ;;  %2207 = vmatprep.mubr.f32.mxu0 %v2996_v32 }
  0xde   :  { %2263 = vmatprep.mubr.f32.mxu1 %v3006_v31  ;;  %v1207_v31 = vlaneseq }
  0xe0   :  { %2208 = vmatmul.mubr.f32.gmra.mrb[30].mxu0 %v3001_v33  ;;  %v3141_v40 = vshrl.u32 %v1207_v31, 7  ;;  %v3147_v47 = vand.u32 127, %v1207_v31 }
  0xe1   :  { %2264 = vmatmul.mubr.f32.gmra.mrb[30].mxu1 %v3011_v37 }
  0xe2   :  { %v1406_v37 = vadd.s32 8, %v3141_v40  ;;  %vm3160_vm0 = vcmp.eq.s32.totalorder %v3141_v40, %v3147_v47 }
  0xe4   :  { %vm3169_vm1 = vcmp.eq.s32.totalorder %v1406_v37, %v3147_v47 }
 0x157   :  { %v3111_v3 = vpop.f32.mrb[0].mxu0 }
 0x158   :  { %v3113_v7 = vpop.f32.mrb[0].mxu1  ;;  %v3115_v8 = vpop.f32.mrb[1].mxu0 }
 0x159   :  { %v3117_v11 = vpop.f32.mrb[1].mxu1 }
 0x15b   :  { %v3119_v16 = vpop.f32.mrb[2].mxu0 }
 0x15c   :  { %v3121_v17 = vpop.f32.mrb[2].mxu1  ;;  %v3123_v22 = vpop.f32.mrb[3].mxu0 }
 0x15d   :  { %v3125_v23 = vpop.f32.mrb[3].mxu1 }
 0x15e   :  { %4173 = vst [vmem:[#allocation18_spill] sm:$0xff] %v3125_v23 }
 0x15f   :  { %v3127_v25 = vpop.f32.mrb[4].mxu0 }
 0x160   :  { %4174 = vst [vmem:[#allocation19_spill] sm:$0xff] %v3127_v25  ;;  %v3129_v28 = vpop.f32.mrb[4].mxu1  ;;  %v3131_v29 = vpop.f32.mrb[5].mxu0 }
 0x161   :  { %4175 = vst [vmem:[#allocation20_spill] sm:$0xff] %v3129_v28  ;;  %4176 = vst [vmem:[#allocation21_spill] sm:$0xff] %v3131_v29  ;;  %v3133_v32 = vpop.f32.mrb[5].mxu1 }
 0x162   :  { %4177 = vst [vmem:[#allocation22_spill] sm:$0xff] %v3133_v32 }
 0x163   :  { %v3135_v33 = vpop.f32.mrb[6].mxu0 }
 0x164   :  { %4178 = vst [vmem:[#allocation23_spill] sm:$0xff] %v3135_v33  ;;  %v3137_v34 = vpop.f32.mrb[6].mxu1  ;;  %v3139_v35 = vpop.f32.mrb[7].mxu0 }
 0x165   :  { %4179 = vst [vmem:[#allocation24_spill] sm:$0xff] %v3137_v34  ;;  %4180 = vst [vmem:[#allocation25_spill] sm:$0xff] %v3139_v35  ;;  %v3143_v41 = vpop.f32.mrb[7].mxu1  ;;  %v1560_v35 = vsel %vm3169_vm1, %v2809_v51, 0.0  ;;  %v1618_v34 = vsel %vm3169_vm1, %v2543_v1, 0.0  ;;  %v1633_v51 = vsel %vm3160_vm0, %v2548_v2, 0.0 }
 0x166   :  { %4181 = vst [vmem:[#allocation26_spill] sm:$0xff] %v3143_v41  ;;  %v1544_v41 = vsel %vm3169_vm1, %v2799_v49, 0.0  ;;  %v3219_v49 = vld [vmem:[%s4133_s2 + $0x88] sm:$0xff]  ;;  %v3227_v1 = vld [vmem:[%s4133_s2 + $0x80] sm:$0xff] }
 0x167   :  { %v3145_v46 = vpop.f32.mrb[8].mxu0  ;;  %v1486_v2 = vsel %vm3169_vm1, %v3219_v49, 0.0  ;;  %v1485_v29 = vsel %vm3160_vm0, %v3227_v1, 0.0 }
 0x168   :  { %4182 = vst [vmem:[#allocation27_spill] sm:$0xff] %v3145_v46  ;;  %v3149_v30 = vpop.f32.mrb[8].mxu1  ;;  %v3151_v45 = vpop.f32.mrb[9].mxu0  ;;  %v1559_v46 = vsel %vm3160_vm0, %v2804_v50, 0.0 }
 0x169   :  { %4183 = vst [vmem:[#allocation28_spill] sm:$0xff] %v3149_v30  ;;  %4184 = vst [vmem:[#allocation29_spill] sm:$0xff] %v3151_v45  ;;  %v3154_v39 = vpop.f32.mrb[9].mxu1  ;;  %v1407_v45 = vadd.s32 16, %v3141_v40 }
 0x16a   :  { %4185 = vst [vmem:[#allocation30_spill] sm:$0xff] %v3154_v39 }
 0x16b   :  { %v3156_v44 = vpop.f32.mrb[10].mxu0  ;;  %vm3231_vm2 = vcmp.eq.s32.totalorder %v1407_v45, %v3147_v47  ;;  %v3249_v45 = vld [vmem:[%s4133_s2 + $0x10] sm:$0xff] }
 0x16c   :  { %4186 = vst [vmem:[#allocation31_spill] sm:$0xff] %v3156_v44  ;;  %v3164_v27 = vpop.f32.mrb[10].mxu1  ;;  %v3166_v31 = vpop.f32.mrb[11].mxu0  ;;  %v3179_v44 = vld [vmem:[%s4133_s2 + $0x8] sm:$0xff]  ;;  %v1545_v30 = vsel %vm3231_vm2, %v2820_v54, 0.0  ;;  %v1561_v42 = vsel %vm3231_vm2, %v2830_v56, 0.0 }
 0x16d   :  { %4189 = vst [vmem:[#allocation32_spill] sm:$0xff] %v3164_v27  ;;  %4190 = vst [vmem:[#allocation33_spill] sm:$0xff] %v3166_v31  ;;  %v3174_v39 = vpop.f32.mrb[11].mxu1  ;;  %v3184_v27 = vld [vmem:[%s4133_s2] sm:$0xff]  ;;  %v1470_v37 = vsel %vm3169_vm1, %v3179_v44, 0.0  ;;  %v1409_v56 = vadd.s32 32, %v3141_v40 }
 0x16e   :  { %4193 = vst [vmem:[#allocation34_spill] sm:$0xff] %v3174_v39  ;;  %v1469_v31 = vsel %vm3160_vm0, %v3184_v27, 0.0  ;;  %v1543_v39 = vsel %vm3160_vm0, %v2794_v48, 0.0  ;;  %v1617_v48 = vsel %vm3160_vm0, %v2538_v0, 0.0  ;;  %v1408_v0 = vadd.s32 24, %v3141_v40 }
 0x16f   :  { %v3198_v43 = vpop.f32.mrb[12].mxu0  ;;  %v1501_v32 = vadd.f32 %v1470_v37, %v1469_v31  ;;  %v1575_v28 = vadd.f32 %v1544_v41, %v1543_v39  ;;  %v1649_v25 = vadd.f32 %v1618_v34, %v1617_v48  ;;  %v1619_v41 = vsel %vm3231_vm2, %v2562_v5, 0.0  ;;  %v3272_v39 = vld [vmem:[%s4133_s2 + $0x18] sm:$0xff] }
 0x170   :  { %4194 = vst [vmem:[#allocation35_spill] sm:$0xff] %v3198_v43  ;;  %v3212_v33 = vpop.f32.mrb[12].mxu1  ;;  %v3214_v50 = vpop.f32.mrb[13].mxu0  ;;  %v1634_v43 = vsel %vm3169_vm1, %v2557_v4, 0.0  ;;  %v1471_v4 = vsel %vm3231_vm2, %v3249_v45, 0.0  ;;  %vm3275_vm3 = vcmp.eq.s32.totalorder %v1408_v0, %v3147_v47  ;;  %v1522_v5 = vadd.f32 %v1486_v2, %v1485_v29 }
 0x171   :  { %4195 = vst [vmem:[#allocation36_spill] sm:$0xff] %v3212_v33  ;;  %4196 = vst [vmem:[#allocation37_spill] sm:$0xff] %v3214_v50  ;;  %v3235_v50 = vpop.f32.mrb[13].mxu1  ;;  %v1472_v37 = vsel %vm3275_vm3, %v3272_v39, 0.0  ;;  %v1635_v48 = vsel %vm3231_vm2, %v2582_v9, 0.0  ;;  %v1576_v0 = vadd.f32 %v1575_v28, %v1545_v30  ;;  %v1562_v9 = vsel %vm3275_vm3, %v2835_v57, 0.0 }
 0x172   :  { %4199 = vst [vmem:[#allocation38_spill] sm:$0xff] %v3235_v50  ;;  %v1596_v50 = vadd.f32 %v1560_v35, %v1559_v46  ;;  %v1670_v46 = vadd.f32 %v1634_v43, %v1633_v51  ;;  %v1502_v43 = vadd.f32 %v1501_v32, %v1471_v4  ;;  %v3291_v51 = vld [vmem:[%s4133_s2 + $0x90] sm:$0xff]  ;;  %v1546_v32 = vsel %vm3275_vm3, %v2825_v55, 0.0  ;;  %v3325_v4 = vld [vmem:[%s4133_s2 + $0x20] sm:$0xff] }
 0x173   :  { %v3254_v23 = vpop.f32.mrb[14].mxu0  ;;  %v1487_v29 = vsel %vm3231_vm2, %v3291_v51, 0.0  ;;  %v1620_v2 = vsel %vm3275_vm3, %v2567_v6, 0.0  ;;  %v1410_v33 = vadd.s32 40, %v3141_v40  ;;  %vm3312_vm4 = vcmp.eq.s32.totalorder %v1409_v56, %v3147_v47 }
 0x174   :  { %4200 = vst [vmem:[#allocation39_spill] sm:$0xff] %v3254_v23  ;;  %v3265_v35 = vpop.f32.mrb[14].mxu1  ;;  %v3267_v34 = vpop.f32.mrb[15].mxu0  ;;  %v1671_v28 = vadd.f32 %v1670_v46, %v1635_v48  ;;  %v1636_v55 = vsel %vm3275_vm3, %v2587_v10, 0.0  ;;  %v1523_v57 = vadd.f32 %v1522_v5, %v1487_v29  ;;  %v1503_v30 = vadd.f32 %v1502_v43, %v1472_v37  ;;  %v4208_v5 = vld [vmem:[#allocation2_spill] sm:$0xff]  ;;  %v3342_v37 = vld [vmem:[%s4133_s2 + $0x28] sm:$0xff] }
 0x175   :  { %4201 = vst [vmem:[#allocation40_spill] sm:$0xff] %v3265_v35  ;;  %4202 = vst [vmem:[#allocation41_spill] sm:$0xff] %v3267_v34  ;;  %v3280_v31 = vpop.f32.mrb[15].mxu1  ;;  %v1597_v34 = vadd.f32 %v1596_v50, %v1561_v42  ;;  %v1650_v35 = vadd.f32 %v1649_v25, %v1619_v41  ;;  %v3308_v25 = vld [vmem:[%s4133_s2 + $0x98] sm:$0xff]  ;;  %v1473_v42 = vsel %vm3312_vm4, %v3325_v4, 0.0  ;;  %v1577_v41 = vadd.f32 %v1576_v0, %v1546_v32  ;;  %v4211_v0 = vld [vmem:[#allocation3_spill] sm:$0xff] }
 0x176   :  { %4205 = vst [vmem:[#allocation42_spill] sm:$0xff] %v3280_v31  ;;  %v1488_v6 = vsel %vm3275_vm3, %v3308_v25, 0.0  ;;  %v1547_v10 = vsel %vm3312_vm4, %v2846_v60, 0.0  ;;  %v1563_v54 = vsel %vm3312_vm4, %v2857_v62, 0.0  ;;  %v1621_v48 = vsel %vm3312_vm4, %v4208_v5, 0.0  ;;  %v3359_v32 = vld [vmem:[%s4133_s2 + $0xa0] sm:$0xff] }
 0x177   :  { %v1598_v46 = vadd.f32 %v1597_v34, %v1562_v9  ;;  %v1651_v56 = vadd.f32 %v1650_v35, %v1620_v2  ;;  %vm3345_vm5 = vcmp.eq.s32.totalorder %v1410_v33, %v3147_v47  ;;  %v1672_v34 = vadd.f32 %v1671_v28, %v1636_v55 }
 0x178   :  { %v1411_v60 = vadd.s32 48, %v3141_v40  ;;  %v1474_v62 = vsel %vm3345_vm5, %v3342_v37, 0.0  ;;  %v1504_v43 = vadd.f32 %v1503_v30, %v1473_v42  ;;  %v1637_v29 = vsel %vm3312_vm4, %v4211_v0, 0.0 }
 0x179   :  { %v1524_v9 = vadd.f32 %v1523_v57, %v1488_v6  ;;  %v1578_v2 = vadd.f32 %v1577_v41, %v1547_v10  ;;  %v1599_v33 = vadd.f32 %v1598_v46, %v1563_v54  ;;  %v1652_v28 = vadd.f32 %v1651_v56, %v1621_v48  ;;  %v3376_v6 = vld [vmem:[%s4133_s2 + $0xa8] sm:$0xff]  ;;  %v3393_v56 = vld [vmem:[%s4133_s2 + $0x30] sm:$0xff] }
 0x17a   :  { %v1489_v55 = vsel %vm3312_vm4, %v3359_v32, 0.0  ;;  %v1548_v30 = vsel %vm3345_vm5, %v2851_v61, 0.0  ;;  %v1564_v42 = vsel %vm3345_vm5, %v2862_v63, 0.0  ;;  %v1622_v5 = vsel %vm3345_vm5, %v2607_v13, 0.0  ;;  %v4214_v61 = vld [vmem:[#allocation4_spill] sm:$0xff] }
 0x17b   :  { %v1673_v57 = vadd.f32 %v1672_v34, %v1637_v29  ;;  %v1412_v50 = vadd.s32 56, %v3141_v40  ;;  %vm3380_vm6 = vcmp.eq.s32.totalorder %v1411_v60, %v3147_v47  ;;  %v1638_v63 = vsel %vm3345_vm5, %v4214_v61, 0.0  ;;  %v4215_v29 = vld [vmem:[#allocation5_spill] sm:$0xff] }
 0x17c   :  { %v1490_v13 = vsel %vm3345_vm5, %v3376_v6, 0.0  ;;  %v1525_v46 = vadd.f32 %v1524_v9, %v1489_v55  ;;  %v1505_v10 = vadd.f32 %v1504_v43, %v1474_v62  ;;  %v1475_v54 = vsel %vm3380_vm6, %v3393_v56, 0.0  ;;  %v3424_v55 = vld [vmem:[%s4133_s2 + $0x38] sm:$0xff] }
 0x17d   :  { %v1579_v48 = vadd.f32 %v1578_v2, %v1548_v30  ;;  %v1600_v34 = vadd.f32 %v1599_v33, %v1564_v42  ;;  %v1653_v60 = vadd.f32 %v1652_v28, %v1622_v5  ;;  %v1549_v0 = vsel %vm3380_vm6, %v2878_v12, 0.0 }
 0x17e   :  { %v1565_v35 = vsel %vm3380_vm6, %v2889_v58, 0.0  ;;  %v1623_v9 = vsel %vm3380_vm6, %v4215_v29, 0.0  ;;  %vm3408_vm7 = vcmp.eq.s32.totalorder %v1412_v50, %v3147_v47  ;;  %v1674_v43 = vadd.f32 %v1673_v57, %v1638_v63  ;;  %v3419_v58 = vld [vmem:[%s4133_s2 + $0xb0] sm:$0xff]  ;;  %v4220_v29 = vld [vmem:[#allocation6_spill] sm:$0xff] }
 0x17f   :  { %v1413_v2 = vadd.s32 64, %v3141_v40  ;;  %v1506_v33 = vadd.f32 %v1505_v10, %v1475_v54  ;;  %v1639_v12 = vsel %vm3380_vm6, %v2644_v20, 0.0  ;;  %v1526_v28 = vadd.f32 %v1525_v46, %v1490_v13  ;;  %v3534_v46 = vld [vmem:[%s4133_s2 + $0x50] sm:$0xff] }
 0x180   :  { %v1580_v30 = vadd.f32 %v1579_v48, %v1549_v0  ;;  %v1601_v42 = vadd.f32 %v1600_v34, %v1565_v35  ;;  %v1654_v5 = vadd.f32 %v1653_v60, %v1623_v9  ;;  %v1491_v57 = vsel %vm3380_vm6, %v3419_v58, 0.0  ;;  %v3458_v60 = vld [vmem:[%s4133_s2 + $0xb8] sm:$0xff]  ;;  %4230 = vst [vmem:[#allocation2_spill] sm:$0xff] %v3534_v46 }
 0x181   :  { %v1476_v20 = vsel %vm3408_vm7, %v3424_v55, 0.0  ;;  %v1550_v50 = vsel %vm3408_vm7, %v2883_v14, 0.0  ;;  %v1566_v61 = vsel %vm3408_vm7, %v2894_v59, 0.0  ;;  %v1624_v63 = vsel %vm3408_vm7, %v2639_v19, 0.0  ;;  %v3453_v59 = vld [vmem:[%s4133_s2 + $0x40] sm:$0xff] }
 0x182   :  { %v1675_v13 = vadd.f32 %v1674_v43, %v1639_v12  ;;  %v1414_v41 = vadd.s32 72, %v3141_v40  ;;  %vm3443_vm8 = vcmp.eq.s32.totalorder %v1413_v2, %v3147_v47  ;;  %v1640_v14 = vsel %vm3408_vm7, %v2649_v21, 0.0  ;;  %v3478_v2 = vld [vmem:[%s4133_s2 + $0x48] sm:$0xff] }
 0x183   :  { %v1527_v10 = vadd.f32 %v1526_v28, %v1491_v57  ;;  %v1507_v54 = vadd.f32 %v1506_v33, %v1476_v20  ;;  %v1581_v19 = vadd.f32 %v1580_v30, %v1550_v50  ;;  %v1602_v48 = vadd.f32 %v1601_v42, %v1566_v61  ;;  %v4223_v28 = vld [vmem:[#allocation8_spill] sm:$0xff] }
 0x184   :  { %v1655_v34 = vadd.f32 %v1654_v5, %v1624_v63  ;;  %v1477_v0 = vsel %vm3443_vm8, %v3453_v59, 0.0  ;;  %v1551_v21 = vsel %vm3443_vm8, %v2910_v24, 0.0  ;;  %v1567_v35 = vsel %vm3443_vm8, %v2921_v52, 0.0  ;;  %v4224_v63 = vld [vmem:[#allocation7_spill] sm:$0xff]  ;;  %v3539_v24 = vld [vmem:[%s4133_s2 + $0x58] sm:$0xff] }
 0x185   :  { %v1625_v9 = vsel %vm3443_vm8, %v4220_v29, 0.0  ;;  %v1492_v43 = vsel %vm3408_vm7, %v3458_v60, 0.0  ;;  %vm3481_vm9 = vcmp.eq.s32.totalorder %v1414_v41, %v3147_v47  ;;  %v1676_v33 = vadd.f32 %v1675_v13, %v1640_v14  ;;  %v3505_v41 = vld [vmem:[%s4133_s2 + $0xc0] sm:$0xff] }
 0x186   :  { %v1415_v52 = vadd.s32 80, %v3141_v40  ;;  %v1478_v12 = vsel %vm3481_vm9, %v3478_v2, 0.0  ;;  %v1641_v62 = vsel %vm3443_vm8, %v4223_v28, 0.0  ;;  %v1416_v30 = vadd.s32 88, %v3141_v40 }
 0x187   :  { %v1508_v42 = vadd.f32 %v1507_v54, %v1477_v0  ;;  %v1582_v5 = vadd.f32 %v1581_v19, %v1551_v21  ;;  %v1603_v57 = vadd.f32 %v1602_v48, %v1567_v35  ;;  %v1656_v20 = vadd.f32 %v1655_v34, %v1625_v9  ;;  %v3510_v54 = vld [vmem:[%s4133_s2 + $0xc8] sm:$0xff]  ;;  %v4227_v48 = vld [vmem:[#allocation9_spill] sm:$0xff] }
 0x188   :  { %v1552_v50 = vsel %vm3481_vm9, %v2915_v26, 0.0  ;;  %v1568_v61 = vsel %vm3481_vm9, %v2926_v53, 0.0  ;;  %v1626_v13 = vsel %vm3481_vm9, %v4224_v63, 0.0  ;;  %v1528_v14 = vadd.f32 %v1527_v10, %v1492_v43 }
 0x189   :  { %v1677_v26 = vadd.f32 %v1676_v33, %v1641_v62  ;;  %v1493_v53 = vsel %vm3443_vm8, %v3505_v41, 0.0  ;;  %vm3516_vm10 = vcmp.eq.s32.totalorder %v1415_v52, %v3147_v47  ;;  %v1642_v34 = vsel %vm3481_vm9, %v4227_v48, 0.0  ;;  %v4234_v48 = vld [vmem:[#allocation12_spill] sm:$0xff] }
 0x18a   :  { %v1494_v10 = vsel %vm3481_vm9, %v3510_v54, 0.0  ;;  %vm3527_vm11 = vcmp.eq.s32.totalorder %v1416_v30, %v3147_v47  ;;  %v1509_v21 = vadd.f32 %v1508_v42, %v1478_v12  ;;  %v1583_v35 = vadd.f32 %v1582_v5, %v1552_v50  ;;  %v3559_v30 = vld [vmem:[%s4133_s2 + $0xd8] sm:$0xff]  ;;  %v4231_v42 = vld [vmem:[#allocation10_spill] sm:$0xff] }
 0x18b   :  { %v1604_v29 = vadd.f32 %v1603_v57, %v1568_v61  ;;  %v1657_v9 = vadd.f32 %v1656_v20, %v1626_v13  ;;  %v1529_v43 = vadd.f32 %v1528_v14, %v1493_v53  ;;  %v1479_v33 = vsel %vm3516_vm10, %v3534_v46, 0.0  ;;  %v4232_v20 = vld [vmem:[#allocation11_spill] sm:$0xff]  ;;  %v4233_v50 = vld [vmem:[#allocation13_spill] sm:$0xff]  ;;  %v129_v61 = vld [vmem:[%s4134_s3 + $0x80] sm:$0xff] }
 0x18c   :  { %v1553_v52 = vsel %vm3516_vm10, %v2942_v36, 0.0  ;;  %v1569_v12 = vsel %vm3516_vm10, %v2953_v18, 0.0  ;;  %v1480_v28 = vsel %vm3527_vm11, %v3539_v24, 0.0  ;;  %v1554_v62 = vsel %vm3527_vm11, %v2947_v38, 0.0  ;;  %v114_v18 = vld [vmem:[%s4134_s3 + $0x8] sm:$0xff] }
 0x18d   :  { %v1627_v36 = vsel %vm3516_vm10, %v4231_v42, 0.0  ;;  %v1678_v5 = vadd.f32 %v1677_v26, %v1642_v34  ;;  %v1570_v57 = vsel %vm3527_vm11, %v2958_v15, 0.0  ;;  %v130_v13 = vld [vmem:[%s4134_s3 + $0x88] sm:$0xff]  ;;  %v113_v15 = vld [vmem:[%s4134_s3] sm:$0xff]  ;;  %v1510_v14 = vadd.f32 %v1509_v21, %v1479_v33  ;;  %v3591_v42 = vld [vmem:[%s4133_s2 + $0xd0] sm:$0xff] }
 0x18e   :  { %v1584_v26 = vadd.f32 %v1583_v35, %v1553_v52  ;;  %v1605_v53 = vadd.f32 %v1604_v29, %v1569_v12  ;;  %v1643_v34 = vsel %vm3516_vm10, %v4234_v48, 0.0  ;;  %v1016_v38 = vmul.f32 %v3111_v3, %v3179_v44  ;;  %v116_v44 = vld [vmem:[%s4134_s3 + $0x18] sm:$0xff] }
 0x18f   :  { %v1658_v21 = vadd.f32 %v1657_v9, %v1627_v36  ;;  %v1495_v35 = vsel %vm3516_vm10, %v3591_v42, 0.0  ;;  %v1032_v12 = vmul.f32 %v3113_v7, %v3219_v49  ;;  %v1015_v48 = vmul.f32 %v3115_v8, %v3184_v27  ;;  %v132_v7 = vld [vmem:[%s4134_s3 + $0x98] sm:$0xff]  ;;  %v115_v27 = vld [vmem:[%s4134_s3 + $0x10] sm:$0xff] }
 0x190   :  { %v1031_v3 = vmul.f32 %v3117_v11, %v3227_v1  ;;  %v3610_v9 = vadd.f32 %v1678_v5, %v1643_v34  ;;  %v1530_v8 = vadd.f32 %v1529_v43, %v1494_v10  ;;  %v131_v11 = vld [vmem:[%s4134_s3 + $0x90] sm:$0xff]  ;;  %v1417_v5 = vadd.s32 96, %v3141_v40 }
 0x191   :  { %v1034_v10 = vmul.f32 %v3121_v17, %v3308_v25  ;;  %v134_v17 = vld [vmem:[%s4134_s3 + $0xa8] sm:$0xff]  ;;  %v3642_v25 = vadd.f32 %v1584_v26, %v1554_v62  ;;  %vm1397_vm0 = vcmask 1041409   ;;  %vm1400_vm1 = vcmask 1041408  }
 0x192   :  { %vm3686_vm13 = vcmp.eq.s32.totalorder %v1417_v5, %v3147_v47  ;;  %vm1218_vm2 = vcmask 130112   ;;  %vm1225_vm3 = vcmask 195712   ;;  %vm1232_vm4 = vcmask 261312  }
 0x193   :  { %vm1239_vm5 = vcmask 326912   ;;  %vm1246_vm6 = vcmask 392512   ;;  %vm1253_vm7 = vcmask 458112   ;;  %vm1260_vm8 = vcmask 523712  }
 0x194   :  { %vm1267_vm9 = vcmask 589312   ;;  %vm1274_vm10 = vcmask 654912  }
 0x197   :  { %v2188_v63 = vpop.f32.mrb[16].mxu0 }
 0x198   :  { %v1048_v29 = vmul.f32 %v2188_v63, %v114_v18  ;;  %v2244_v33 = vpop.f32.mrb[16].mxu1  ;;  %v791_v52 = vpop.f32.mrb[17].mxu0  ;;  %v1418_v18 = vadd.s32 104, %v3141_v40 }
 0x199   :  { %v1064_v31 = vmul.f32 %v2244_v33, %v130_v13  ;;  %v1047_v23 = vmul.f32 %v791_v52, %v113_v15  ;;  %v936_v46 = vpop.f32.mrb[17].mxu1  ;;  %v3634_v52 = vadd.f32 %v1510_v14, %v1480_v28 }
 0x19a   :  { %v1063_v36 = vmul.f32 %v936_v46, %v129_v61  ;;  %v1080_v49 = vadd.f32 %v1048_v29, %v1016_v38  ;;  %v1018_v46 = vmul.f32 %v3119_v16, %v3272_v39  ;;  %v118_v16 = vld [vmem:[%s4134_s3 + $0x28] sm:$0xff]  ;;  %v4235_v39 = vld [vmem:[#allocation18_spill] sm:$0xff]  ;;  %vm3681_vm12 = vcmp.eq.s32.totalorder %v1418_v18, %v3147_v47 }
 0x19b   :  { %v2191_v63 = vpop.f32.mrb[18].mxu0  ;;  %v1096_v13 = vadd.f32 %v1064_v31, %v1032_v12  ;;  %v1079_v1 = vadd.f32 %v1047_v23, %v1015_v48  ;;  %v1017_v31 = vmul.f32 %v3123_v22, %v3249_v45  ;;  %v1033_v33 = vmul.f32 %v4235_v39, %v3291_v51  ;;  %v117_v22 = vld [vmem:[%s4134_s3 + $0x20] sm:$0xff] }
 0x19c   :  { %v1050_v38 = vmul.f32 %v2191_v63, %v116_v44  ;;  %v2247_v61 = vpop.f32.mrb[18].mxu1  ;;  %1113 = vadd.xlane.f32.xlu0 %v1080_v49  ;;  %v801_v15 = vpop.f32.mrb[19].mxu0  ;;  %v1095_v34 = vadd.f32 %v1063_v36, %v1031_v3  ;;  %v3644_v48 = vadd.f32 %v1605_v53, %v1570_v57  ;;  %v133_v51 = vld [vmem:[%s4134_s3 + $0xa0] sm:$0xff]  ;;  %v4236_v3 = vld [vmem:[#allocation19_spill] sm:$0xff] }
 0x19d   :  { %v1066_v43 = vmul.f32 %v2247_v61, %v132_v7  ;;  %1145 = vadd.xlane.f32.xlu1 %v1096_v13  ;;  %v946_v29 = vpop.f32.mrb[19].mxu1  ;;  %v1049_v23 = vmul.f32 %v801_v15, %v115_v27  ;;  %v1020_v36 = vmul.f32 %v4236_v3, %v3342_v37  ;;  %v4237_v7 = vsel %vm3527_vm11, %v4232_v20, 0.0  ;;  %v4238_v27 = vld [vmem:[#allocation20_spill] sm:$0xff]  ;;  %v4239_v13 = vld [vmem:[#allocation21_spill] sm:$0xff] }
 0x19e   :  { %v1065_v12 = vmul.f32 %v946_v29, %v131_v11  ;;  %v1082_v45 = vadd.f32 %v1050_v38, %v1018_v46  ;;  %v3655_v49 = vadd.f32 %v1658_v21, %v4237_v7  ;;  %v1036_v63 = vmul.f32 %v4238_v27, %v3376_v6  ;;  %v120_v20 = vld [vmem:[%s4134_s3 + $0x38] sm:$0xff]  ;;  %v4240_v21 = vld [vmem:[#allocation22_spill] sm:$0xff]  ;;  %v119_v15 = vld [vmem:[%s4134_s3 + $0x30] sm:$0xff] }
 0x19f   :  { %v2194_v44 = vpop.f32.mrb[20].mxu0  ;;  %v1098_v28 = vadd.f32 %v1066_v43, %v1034_v10  ;;  %v1081_v14 = vadd.f32 %v1049_v23, %v1017_v31  ;;  %v1019_v11 = vmul.f32 %v4239_v13, %v3325_v4  ;;  %v1035_v61 = vmul.f32 %v4240_v21, %v3359_v32  ;;  %v136_v4 = vld [vmem:[%s4134_s3 + $0xb8] sm:$0xff]  ;;  %v4245_v43 = vld [vmem:[#allocation23_spill] sm:$0xff]  ;;  %v137_v13 = vld [vmem:[%s4134_s3 + $0xc0] sm:$0xff] }
 0x1a0   :  { %v1052_v62 = vmul.f32 %v2194_v44, %v118_v16  ;;  %v2250_v26 = vpop.f32.mrb[20].mxu1  ;;  %1111 = vadd.xlane.f32.xlu0 %v1079_v1  ;;  %v811_v57 = vpop.f32.mrb[21].mxu0  ;;  %v1097_v53 = vadd.f32 %v1065_v12, %v1033_v33  ;;  %v3670_v1 = vadd.f32 %v1530_v8, %v1495_v35  ;;  %v135_v8 = vld [vmem:[%s4134_s3 + $0xb0] sm:$0xff]  ;;  %v1022_v18 = vmul.f32 %v4245_v43, %v3424_v55  ;;  %v4255_v43 = vld [vmem:[#allocation29_spill] sm:$0xff] }
 0x1a1   :  { %v1068_v46 = vmul.f32 %v2250_v26, %v134_v17  ;;  %1143 = vadd.xlane.f32.xlu1 %v1095_v34  ;;  %v956_v37 = vpop.f32.mrb[21].mxu1  ;;  %v1051_v38 = vmul.f32 %v811_v57, %v117_v22  ;;  %v4246_v29 = vsel %vm3527_vm11, %v4233_v50, 0.0  ;;  %v4247_v12 = vld [vmem:[#allocation24_spill] sm:$0xff]  ;;  %v4248_v22 = vld [vmem:[#allocation25_spill] sm:$0xff]  ;;  %v122_v50 = vld [vmem:[%s4134_s3 + $0x48] sm:$0xff] }
 0x1a2   :  { %v1067_v6 = vmul.f32 %v956_v37, %v133_v51  ;;  %v3678_v34 = vadd.f32 %v1052_v62, %v1020_v36  ;;  %v3704_v5 = vadd.f32 %v3610_v9, %v4246_v29  ;;  %v1038_v17 = vmul.f32 %v4247_v12, %v3458_v60  ;;  %v4249_v9 = vld [vmem:[#allocation26_spill] sm:$0xff]  ;;  %v4250_v36 = vld [vmem:[#allocation15_spill] sm:$0xff]  ;;  %v4251_v26 = vld [vmem:[#allocation17_spill] sm:$0xff] }
 0x1a3   :  { %v2197_v35 = vpop.f32.mrb[22].mxu0  ;;  %v3693_v10 = vadd.f32 %v1068_v46, %v1036_v63  ;;  %v3695_v31 = vadd.f32 %v1051_v38, %v1019_v11  ;;  %v1021_v44 = vmul.f32 %v4248_v22, %v3393_v56  ;;  %v1556_v7 = vsel %vm3681_vm12, %v4250_v36, 0.0  ;;  %v138_v56 = vld [vmem:[%s4134_s3 + $0xc8] sm:$0xff]  ;;  %v121_v60 = vld [vmem:[%s4134_s3 + $0x40] sm:$0xff] }
 0x1a4   :  { %v1054_v23 = vmul.f32 %v2197_v35, %v120_v20  ;;  %v2253_v16 = vpop.f32.mrb[22].mxu1  ;;  %1117 = vadd.xlane.f32.xlu0 %v1082_v45  ;;  %v821_v39 = vpop.f32.mrb[23].mxu0  ;;  %v3706_v33 = vadd.f32 %v1067_v6, %v1035_v61  ;;  %v1037_v45 = vmul.f32 %v4249_v9, %v3419_v58  ;;  %v1572_v57 = vsel %vm3681_vm12, %v4251_v26, 0.0  ;;  %v3734_v58 = vld [vmem:[%s4131_s1 + $0x68] sm:$0xff]  ;;  %v4253_v20 = vld [vmem:[#allocation14_spill] sm:$0xff]  ;;  %v4254_v35 = vld [vmem:[#allocation28_spill] sm:$0xff] }
 0x1a5   :  { %v1070_v55 = vmul.f32 %v2253_v16, %v136_v4  ;;  %1149 = vadd.xlane.f32.xlu1 %v1098_v28  ;;  %v966_v51 = vpop.f32.mrb[23].mxu1  ;;  %v1053_v3 = vmul.f32 %v821_v39, %v119_v15  ;;  %v1630_v27 = vsel %vm3681_vm12, %v3734_v58, 0.0  ;;  %v4252_v37 = vld [vmem:[#allocation27_spill] sm:$0xff]  ;;  %v1555_v21 = vsel %vm3686_vm13, %v4253_v20, 0.0  ;;  %v124_v16 = vld [vmem:[%s4134_s3 + $0x58] sm:$0xff]  ;;  %v4256_v39 = vld [vmem:[#allocation30_spill] sm:$0xff] }
 0x1a6   :  { %v1069_v62 = vmul.f32 %v966_v51, %v135_v8  ;;  %v3726_v28 = vadd.f32 %v1054_v23, %v1022_v18  ;;  %v1024_v38 = vmul.f32 %v4252_v37, %v3478_v2  ;;  %v1040_v8 = vmul.f32 %v4254_v35, %v3510_v54  ;;  %v3765_v12 = vld [vmem:[%s4131_s1 + $0xe8] sm:$0xff]  ;;  %v2505_v58 = vld [vmem:[%s4131_s1 + $0xf0] sm:$0xff] }
 0x1a7   :  { %v2200_v63 = vpop.f32.mrb[24].mxu0  ;;  %v3742_v11 = vadd.f32 %v1070_v55, %v1038_v17  ;;  %v3744_v46 = vadd.f32 %v1053_v3, %v1021_v44  ;;  %v1023_v18 = vmul.f32 %v4255_v43, %v3453_v59  ;;  %v1646_v59 = vsel %vm3681_vm12, %v3765_v12, 0.0  ;;  %v123_v17 = vld [vmem:[%s4134_s3 + $0x50] sm:$0xff]  ;;  %v126_v43 = vld [vmem:[%s4134_s3 + $0x68] sm:$0xff] }
 0x1a8   :  { %v1056_v61 = vmul.f32 %v2200_v63, %v122_v50  ;;  %v2256_v6 = vpop.f32.mrb[24].mxu1  ;;  %1115 = vadd.xlane.f32.xlu0 %v1081_v14  ;;  %v831_v4 = vpop.f32.mrb[25].mxu0  ;;  %v3751_v15 = vadd.f32 %v1069_v62, %v1037_v45  ;;  %v1039_v14 = vmul.f32 %v4256_v39, %v3505_v41  ;;  %v4257_v41 = vld [vmem:[#allocation16_spill] sm:$0xff]  ;;  %v3782_v55 = vadd.f32 %v3642_v25, %v1555_v21  ;;  %v4258_v45 = vld [vmem:[#allocation31_spill] sm:$0xff]  ;;  %v4260_v21 = vld [vmem:[#allocation2_spill] sm:$0xff] }
 0x1a9   :  { %v1072_v29 = vmul.f32 %v2256_v6, %v138_v56  ;;  %1147 = vadd.xlane.f32.xlu1 %v1097_v53  ;;  %v976_v23 = vpop.f32.mrb[25].mxu1  ;;  %v1055_v2 = vmul.f32 %v831_v4, %v121_v60  ;;  %v140_v53 = vld [vmem:[%s4134_s3 + $0xd8] sm:$0xff]  ;;  %v1571_v44 = vsel %vm3686_vm13, %v4257_v41, 0.0  ;;  %v139_v3 = vld [vmem:[%s4134_s3 + $0xd0] sm:$0xff]  ;;  %v1026_v62 = vmul.f32 %v4258_v45, %v3539_v24  ;;  %v2500_v56 = vld [vmem:[%s4131_s1 + $0x60] sm:$0xff] }
 0x1aa   :  { %v1071_v54 = vmul.f32 %v976_v23, %v137_v13  ;;  %v3776_v22 = vadd.f32 %v1056_v61, %v1024_v38  ;;  %v1629_v25 = vsel %vm3686_vm13, %v2500_v56, 0.0  ;;  %v4259_v38 = vld [vmem:[#allocation32_spill] sm:$0xff]  ;;  %v4261_v61 = vld [vmem:[#allocation33_spill] sm:$0xff]  ;;  %v3808_v6 = vld [vmem:[%s4133_s2 + $0x68] sm:$0xff] }
 0x1ab   :  { %v2203_v51 = vpop.f32.mrb[26].mxu0  ;;  %v3787_v50 = vadd.f32 %v1072_v29, %v1040_v8  ;;  %v3789_v9 = vadd.f32 %v1055_v2, %v1023_v18  ;;  %v1042_v20 = vmul.f32 %v4259_v38, %v3559_v30  ;;  %v1025_v24 = vmul.f32 %v4261_v61, %v4260_v21  ;;  %v3813_v4 = vld [vmem:[%s4133_s2 + $0xe8] sm:$0xff]  ;;  %v4262_v18 = vld [vmem:[#allocation34_spill] sm:$0xff]  ;;  %v4264_v38 = vld [vmem:[#allocation36_spill] sm:$0xff] }
 0x1ac   :  { %v1058_v60 = vmul.f32 %v2203_v51, %v124_v16  ;;  %v2259_v63 = vpop.f32.mrb[26].mxu1  ;;  %1121 = vadd.xlane.f32.xlu0 %v3678_v34  ;;  %v841_v13 = vpop.f32.mrb[27].mxu0  ;;  %v3799_v37 = vadd.f32 %v1071_v54, %v1039_v14  ;;  %v1041_v29 = vmul.f32 %v4262_v18, %v3591_v42  ;;  %v3824_v23 = vld [vmem:[%s4133_s2 + $0x60] sm:$0xff]  ;;  %v3827_v2 = vadd.f32 %v3644_v48, %v1571_v44 }
 0x1ad   :  { %v1074_v34 = vmul.f32 %v2259_v63, %v140_v53  ;;  %1153 = vadd.xlane.f32.xlu1 %v3693_v10  ;;  %v986_v35 = vpop.f32.mrb[27].mxu1  ;;  %v1057_v8 = vmul.f32 %v841_v13, %v123_v17  ;;  %v142_v10 = vld [vmem:[%s4134_s3 + $0xe8] sm:$0xff]  ;;  %v125_v39 = vld [vmem:[%s4134_s3 + $0x60] sm:$0xff]  ;;  %v1419_v53 = vadd.s32 112, %v3141_v40  ;;  %v1044_v21 = vmul.f32 %v4264_v38, %v3813_v4 }
 0x1ae   :  { %v1073_v16 = vmul.f32 %v986_v35, %v139_v3  ;;  %v3835_v14 = vadd.f32 %v1058_v60, %v1026_v62  ;;  %v2501_v42 = vld [vmem:[%s4131_s1 + $0xe0] sm:$0xff]  ;;  %v4263_v3 = vld [vmem:[#allocation35_spill] sm:$0xff]  ;;  %v1420_v62 = vadd.s32 120, %v3141_v40  ;;  %v1660_v18 = vadd.f32 %v3655_v49, %v1629_v25 }
 0x1af   :  { %v1645_v54 = vsel %vm3686_vm13, %v2501_v42, 0.0  ;;  %v3845_v48 = vld [vmem:[%s4133_s2 + $0xe0] sm:$0xff]  ;;  %v2206_v17 = vpop.f32.mrb[28].mxu0  ;;  %v3851_v44 = vadd.f32 %v1074_v34, %v1042_v20  ;;  %v3853_v51 = vadd.f32 %v1057_v8, %v1025_v24  ;;  %v1028_v45 = vmul.f32 %v4263_v3, %v3808_v6  ;;  %v4265_v20 = vld [vmem:[#allocation37_spill] sm:$0xff]  ;;  %v3885_v42 = vld [vmem:[%s4133_s2 + $0x70] sm:$0xff] }
 0x1b0   :  { %v141_v41 = vld [vmem:[%s4134_s3 + $0xe0] sm:$0xff]  ;;  %v1060_v56 = vmul.f32 %v2206_v17, %v126_v43  ;;  %v2262_v60 = vpop.f32.mrb[28].mxu1  ;;  %1119 = vadd.xlane.f32.xlu0 %v3695_v31  ;;  %v851_v63 = vpop.f32.mrb[29].mxu0  ;;  %v3859_v13 = vadd.f32 %v1073_v16, %v1041_v29  ;;  %v1027_v61 = vmul.f32 %v4265_v20, %v3824_v23  ;;  %v3868_v24 = vld [vmem:[%s4133_s2 + $0x78] sm:$0xff]  ;;  %v1681_v49 = vadd.f32 %v3704_v5, %v1645_v54  ;;  %v4269_v5 = vld [vmem:[#allocation39_spill] sm:$0xff] }
 0x1b1   :  { %v3873_v34 = vld [vmem:[%s4133_s2 + $0xf8] sm:$0xff]  ;;  %v1076_v31 = vmul.f32 %v2262_v60, %v142_v10  ;;  %1151 = vadd.xlane.f32.xlu1 %v3706_v33  ;;  %v996_v35 = vpop.f32.mrb[29].mxu1  ;;  %v1059_v8 = vmul.f32 %v851_v63, %v125_v39  ;;  %v4266_v29 = vld [vmem:[#allocation38_spill] sm:$0xff]  ;;  %v127_v10 = vld [vmem:[%s4134_s3 + $0x70] sm:$0xff]  ;;  %vm3897_vm14 = vcmp.eq.s32.totalorder %v1419_v53, %v3147_v47  ;;  %v1030_v54 = vmul.f32 %v4269_v5, %v3868_v24 }
 0x1b2   :  { %v128_v43 = vld [vmem:[%s4134_s3 + $0x78] sm:$0xff]  ;;  %v1043_v16 = vmul.f32 %v4266_v29, %v3845_v48  ;;  %v1075_v17 = vmul.f32 %v996_v35, %v141_v41  ;;  %v3893_v39 = vadd.f32 %v1060_v56, %v1028_v45  ;;  %v3904_v41 = vld [vmem:[%s4133_s2 + $0xf0] sm:$0xff]  ;;  %vm3916_vm15 = vcmp.eq.s32.totalorder %v1420_v62, %v3147_v47 }
 0x1b3   :  { %v144_v33 = vld [vmem:[%s4134_s3 + $0xf8] sm:$0xff]  ;;  %v2209_v3 = vpop.f32.mrb[30].mxu0  ;;  %v143_v60 = vld [vmem:[%s4134_s3 + $0xf0] sm:$0xff]  ;;  %v3909_v63 = vadd.f32 %v1076_v31, %v1044_v21  ;;  %v3911_v45 = vadd.f32 %v1059_v8, %v1027_v61  ;;  %v1497_v36 = vsel %vm3686_vm13, %v3845_v48, 0.0  ;;  %v1647_v19 = vsel %vm3897_vm14, %v2505_v58, 0.0 }
 0x1b4   :  { %v1062_v56 = vmul.f32 %v2209_v3, %v128_v43  ;;  %v2265_v38 = vpop.f32.mrb[30].mxu1  ;;  %1125 = vadd.xlane.f32.xlu0 %v3726_v28  ;;  %v861_v20 = vpop.f32.mrb[31].mxu0  ;;  %v3921_v35 = vadd.f32 %v1075_v17, %v1043_v16  ;;  %v4272_v21 = vld [vmem:[#allocation40_spill] sm:$0xff]  ;;  %v4273_v61 = vld [vmem:[#allocation41_spill] sm:$0xff]  ;;  %v4274_v16 = vld [vmem:[#allocation42_spill] sm:$0xff]  ;;  %v1499_v32 = vsel %vm3897_vm14, %v3904_v41, 0.0 }
 0x1b5   :  { %v1046_v31 = vmul.f32 %v4272_v21, %v3873_v34  ;;  %v1029_v8 = vmul.f32 %v4273_v61, %v3885_v42  ;;  %v1078_v29 = vmul.f32 %v2265_v38, %v144_v33  ;;  %1157 = vadd.xlane.f32.xlu1 %v3742_v11  ;;  %v1006_v62 = vpop.f32.mrb[31].mxu1  ;;  %v1061_v5 = vmul.f32 %v861_v20, %v127_v10  ;;  %v2502_v43 = vld [vmem:[%s4132_s0 + $0x70] sm:$0xff] }
 0x1b6   :  { %v1557_v28 = vsel %vm3897_vm14, %v2502_v43, 0.0  ;;  %v1045_v17 = vmul.f32 %v4274_v16, %v3904_v41  ;;  %v1077_v3 = vmul.f32 %v1006_v62, %v143_v60  ;;  %v3935_v21 = vadd.f32 %v1062_v56, %v1030_v54  ;;  %v2503_v33 = vld [vmem:[%s4132_s0 + $0xf0] sm:$0xff] }
 0x1b7   :  { %v1573_v11 = vsel %vm3897_vm14, %v2503_v33, 0.0  ;;  %v2504_v10 = vld [vmem:[%s4131_s1 + $0x70] sm:$0xff]  ;;  %v3947_v20 = vadd.f32 %v1061_v5, %v1029_v8  ;;  %v3949_v61 = vadd.f32 %v1078_v29, %v1046_v31  ;;  %v1587_v54 = vadd.f32 %v3782_v55, %v1556_v7 }
 0x1b8   :  { %v1631_v38 = vsel %vm3897_vm14, %v2504_v10, 0.0  ;;  %1123 = vadd.xlane.f32.xlu0 %v3744_v46  ;;  %v3952_v60 = vadd.f32 %v1077_v3, %v1045_v17  ;;  %v1608_v56 = vadd.f32 %v3827_v2, %v1572_v57  ;;  %v1661_v31 = vadd.f32 %v1660_v18, %v1630_v27  ;;  %v2508_v2 = vld [vmem:[%s4131_s1 + $0x78] sm:$0xff] }
 0x1b9   :  { %v1481_v46 = vsel %vm3686_vm13, %v3824_v23, 0.0  ;;  %v4275_v7 = vsel %vm3527_vm11, %v3559_v30, 0.0  ;;  %1155 = vadd.xlane.f32.xlu1 %v3751_v15  ;;  %v1682_v57 = vadd.f32 %v1681_v49, %v1646_v59  ;;  %v1588_v27 = vadd.f32 %v1587_v54, %v1557_v28  ;;  %v2506_v30 = vld [vmem:[%s4132_s0 + $0x78] sm:$0xff] }
 0x1ba   :  { %v1532_v26 = vadd.f32 %v3670_v1, %v4275_v7  ;;  %v1609_v0 = vadd.f32 %v1608_v56, %v1573_v11  ;;  %v1662_v55 = vadd.f32 %v1661_v31, %v1631_v38  ;;  %v1558_v1 = vsel %vm3916_vm15, %v2506_v30, 0.0  ;;  %v2507_v15 = vld [vmem:[%s4132_s0 + $0xf8] sm:$0xff] }
 0x1bb   :  { %v1574_v12 = vsel %vm3916_vm15, %v2507_v15, 0.0  ;;  %v1589_v59 = vadd.f32 %v1588_v27, %v1558_v1  ;;  %v1632_v48 = vsel %vm3916_vm15, %v2508_v2, 0.0  ;;  %v2509_v18 = vld [vmem:[%s4131_s1 + $0xf8] sm:$0xff]  ;;  %v1512_v8 = vadd.f32 %v3634_v52, %v1481_v46 }
 0x1bc   :  { %1129 = vadd.xlane.f32.xlu0 %v3776_v22  ;;  %v1610_v23 = vadd.f32 %v1609_v0, %v1574_v12  ;;  %v1648_v49 = vsel %vm3916_vm15, %v2509_v18, 0.0  ;;  %v1533_v29 = vadd.f32 %v1532_v26, %v1497_v36  ;;  %v1663_v22 = vadd.f32 %v1662_v55, %v1632_v48 }
 0x1bd   :  { %1161 = vadd.xlane.f32.xlu1 %v3787_v50  ;;  %v1683_v62 = vadd.f32 %v1682_v57, %v1647_v19  ;;  %v1482_v5 = vsel %vm3681_vm12, %v3808_v6, 0.0  ;;  %v1498_v43 = vsel %vm3681_vm12, %v3813_v4, 0.0  ;;  %v1590_v28 = vrot.slane %v1589_v59, 4 }
 0x1be   :  { %v1611_v16 = vrot.slane %v1610_v23, 4  ;;  %v1664_v17 = vrot.slane %v1663_v22, 4  ;;  %v1513_v11 = vadd.f32 %v1512_v8, %v1482_v5  ;;  %v1534_v50 = vadd.f32 %v1533_v29, %v1498_v43 }
 0x1bf   :  { %v1684_v3 = vadd.f32 %v1683_v62, %v1648_v49  ;;  %v1591_v52 = vadd.f32 %v1590_v28, %v1589_v59  ;;  %v1483_v6 = vsel %vm3897_vm14, %v3885_v42, 0.0  ;;  %v1484_v42 = vsel %vm3916_vm15, %v3868_v24, 0.0 }
 0x1c0   :  { %1127 = vadd.xlane.f32.xlu0 %v3789_v9  ;;  %v1612_v33 = vadd.f32 %v1611_v16, %v1610_v23  ;;  %v1665_v10 = vadd.f32 %v1664_v17, %v1663_v22  ;;  %v1514_v36 = vadd.f32 %v1513_v11, %v1483_v6  ;;  %v1500_v25 = vsel %vm3916_vm15, %v3873_v34, 0.0 }
 0x1c1   :  { %1159 = vadd.xlane.f32.xlu1 %v3799_v37  ;;  %v1685_v38 = vrot.slane %v1684_v3, 4  ;;  %v1592_v4 = vrot.slane %v1591_v52, 2  ;;  %v1535_v37 = vadd.f32 %v1534_v50, %v1499_v32  ;;  %vm1281_vm11 = vcmask 720512  }
 0x1c2   :  { %v1613_v54 = vrot.slane %v1612_v33, 2  ;;  %v1666_v56 = vrot.slane %v1665_v10, 2  ;;  %v1515_v0 = vadd.f32 %v1514_v36, %v1484_v42  ;;  %vm1288_vm12 = vcmask 786112  }
 0x1c3   :  { %v1686_v9 = vadd.f32 %v1685_v38, %v1684_v3  ;;  %v1593_v31 = vadd.f32 %v1592_v4, %v1591_v52  ;;  %vm1295_vm13 = vcmask 851712   ;;  %vm1302_vm14 = vcmask 917312  }
 0x1c4   :  { %1133 = vadd.xlane.f32.xlu0 %v3835_v14  ;;  %v1614_v46 = vadd.f32 %v1613_v54, %v1612_v33  ;;  %v1667_v7 = vadd.f32 %v1666_v56, %v1665_v10  ;;  %v1516_v34 = vrot.slane %v1515_v0, 4  ;;  %v1220_v54 = vadd.s32 4294967280, %v3147_v47 }
 0x1c5   :  { %1165 = vadd.xlane.f32.xlu1 %v3851_v44  ;;  %v1687_v26 = vrot.slane %v1686_v9, 2  ;;  %v1594_v41 = vrot.slane %v1593_v31, 1  ;;  %v1536_v44 = vadd.f32 %v1535_v37, %v1500_v25  ;;  %v1213_v56 = vadd.s32 4294967288, %v3147_v47 }
 0x1c6   :  { %v1615_v57 = vrot.slane %v1614_v46, 1  ;;  %v1668_v58 = vrot.slane %v1667_v7, 1  ;;  %v1517_v2 = vadd.f32 %v1516_v34, %v1515_v0  ;;  %v1223_v36 = vsub.s32 %v1220_v54, %v3141_v40 }
 0x1c7   :  { %v1688_v14 = vadd.f32 %v1687_v26, %v1686_v9  ;;  %v1595_v19 = vadd.f32 %v1594_v41, %v1593_v31  ;;  %v1537_v53 = vrot.slane %v1536_v44, 4  ;;  %v1211_v31 = vsub.s32 %v3147_v47, %v3141_v40 }
 0x1c8   :  { %1131 = vadd.xlane.f32.xlu0 %v3853_v51  ;;  %v1616_v27 = vadd.f32 %v1615_v57, %v1614_v46  ;;  %v1669_v55 = vadd.f32 %v1668_v58, %v1667_v7  ;;  %v1518_v48 = vrot.slane %v1517_v2, 2  ;;  %v1234_v37 = vadd.s32 4294967264, %v3147_v47 }
 0x1c9   :  { %1163 = vadd.xlane.f32.xlu1 %v3859_v13  ;;  %v1689_v30 = vrot.slane %v1688_v14, 1  ;;  %v1698_v1 = vmul.f32 %v1595_v19, %v1595_v19  ;;  %v1538_v13 = vadd.f32 %v1537_v53, %v1536_v44  ;;  %v1216_v7 = vsub.s32 %v1213_v56, %v3141_v40 }
 0x1ca   :  { %v1699_v15 = vmul.f32 %v1616_v27, %v1616_v27  ;;  %v1700_v12 = vmul.f32 %v1669_v55, %v1669_v55  ;;  %v1227_v26 = vadd.s32 4294967272, %v3147_v47  ;;  %v1241_v41 = vadd.s32 4294967256, %v3147_v47 }
 0x1cb   :  { %v1690_v24 = vadd.f32 %v1689_v30, %v1688_v14  ;;  %v1539_v18 = vrot.slane %v1538_v13, 2  ;;  %v1237_v19 = vsub.s32 %v1234_v37, %v3141_v40  ;;  %v1248_v27 = vadd.s32 4294967248, %v3147_v47 }
 0x1cc   :  { %1137 = vadd.xlane.f32.xlu0 %v3893_v39  ;;  %v1702_v51 = vadd.f32 %v1700_v12, %v1698_v1  ;;  %v1230_v44 = vsub.s32 %v1227_v26, %v3141_v40  ;;  %v1255_v1 = vadd.s32 4294967240, %v3147_v47  ;;  %v1244_v12 = vsub.s32 %v1241_v41, %v3141_v40 }
 0x1cd   :  { %1169 = vadd.xlane.f32.xlu1 %v3909_v63  ;;  %v1701_v59 = vmul.f32 %v1690_v24, %v1690_v24  ;;  %v1519_v63 = vadd.f32 %v1518_v48, %v1517_v2  ;;  %v1540_v49 = vadd.f32 %v1539_v18, %v1538_v13  ;;  %v1262_v34 = vadd.s32 4294967232, %v3147_v47 }
 0x1ce   :  { %2490 = vlog2.f32 %v1702_v51  ;;  %v1251_v2 = vsub.s32 %v1248_v27, %v3141_v40  ;;  %v1297_v37 = vadd.s32 4294967192, %v3147_v47  ;;  %vm1309_vm15 = vcmask 982912  }
 0x1cf   :  { %v1703_v23 = vadd.f32 %v1701_v59, %v1699_v15  ;;  %v1520_v29 = vrot.slane %v1519_v63, 1  ;;  %v1541_v22 = vrot.slane %v1540_v49, 1 }
 0x1d0   :  { %1135 = vadd.xlane.f32.xlu0 %v3911_v45 }
 0x1d1   :  { %1167 = vadd.xlane.f32.xlu1 %v3921_v35  ;;  %2492 = vlog2.f32 %v1703_v23  ;;  %v1521_v62 = vadd.f32 %v1520_v29, %v1519_v63  ;;  %v1542_v5 = vadd.f32 %v1541_v22, %v1540_v49  ;;  %v1258_v63 = vsub.s32 %v1255_v1, %v3141_v40 }
 0x1d2   :  { %v1265_v29 = vsub.s32 %v1262_v34, %v3141_v40  ;;  %v1311_v1 = vadd.s32 4294967176, %v3147_v47 }
 0x1d4   :  { %1139 = vadd.xlane.f32.xlu0 %v3947_v20 }
 0x1d5   :  { %1171 = vadd.xlane.f32.xlu1 %v3952_v60 }
 0x1d8   :  { %1141 = vadd.xlane.f32.xlu0 %v3935_v21  ;;  %v2491_v39 = vpop.eup %2490  ;;  %v1693_v21 = vsel %vm1397_vm0, %v1542_v5, %v1521_v62  ;;  %v1276_v5 = vadd.s32 4294967216, %v3147_v47 }
 0x1d9   :  { %1173 = vadd.xlane.f32.xlu1 %v3949_v61  ;;  %v1705_v8 = vmul.f32 0.6931472, %v2491_v39  ;;  %v1695_v61 = vsel %vm1400_vm1, %v1693_v21, 0.0 }
 0x1db   :  { %v2493_v45 = vpop.eup %2492 }
 0x1dc   :  { %v1707_v35 = vmul.f32 0.6931472, %v2493_v45  ;;  %v1269_v45 = vadd.s32 4294967224, %v3147_v47 }
 0x1dd   :  { %1696 = vadd.xlane.f32.xlu1 %v1695_v61 }
 0x1de   :  { %v1710_v20 = vsel %vm1397_vm0, %v1707_v35, %v1705_v8 }
 0x1df   :  { %v1712_v60 = vsel %vm1400_vm1, %v1710_v20, 0.0 }
 0x1e0   :  { %1713 = vadd.xlane.f32.xlu0 %v1712_v60 }
 0x229   :  { %v1114_v43 = vpop.xlane.xlu0 %1113 }
 0x22a   :  { %v1146_v28 = vpop.xlane.xlu1 %1145  ;;  %v1217_v0 = vrot.slane %v1114_v43, %v1216_v7 }
 0x22b   :  { %v1325_v30 = vrot.slane %v1146_v28, %v1216_v7  ;;  %v1283_v28 = vadd.s32 4294967208, %v3147_v47 }
 0x22d   :  { %v1112_v16 = vpop.xlane.xlu0 %1111 }
 0x22e   :  { %v1144_v17 = vpop.xlane.xlu1 %1143  ;;  %v1212_v25 = vrot.slane %v1112_v16, %v1211_v31 }
 0x22f   :  { %v1321_v58 = vrot.slane %v1144_v17, %v1211_v31  ;;  %v1286_v31 = vsub.s32 %v1283_v28, %v3141_v40 }
 0x230   :  { %v1219_v15 = vsel %vm1218_vm2, %v1217_v0, %v1212_v25 }
 0x231   :  { %v1118_v3 = vpop.xlane.xlu0 %1117  ;;  %v1326_v59 = vsel %vm1218_vm2, %v1325_v30, %v1321_v58  ;;  %v1304_v58 = vadd.s32 4294967184, %v3147_v47  ;;  %vm1316_vm2 = vcmask 1048512  }
 0x232   :  { %v1150_v52 = vpop.xlane.xlu1 %1149  ;;  %v1231_v13 = vrot.slane %v1118_v3, %v1230_v44  ;;  %v1272_v3 = vsub.s32 %v1269_v45, %v3141_v40 }
 0x233   :  { %v1335_v39 = vrot.slane %v1150_v52, %v1230_v44 }
 0x235   :  { %v1116_v33 = vpop.xlane.xlu0 %1115 }
 0x236   :  { %v1148_v11 = vpop.xlane.xlu1 %1147  ;;  %v1224_v14 = vrot.slane %v1116_v33, %v1223_v36  ;;  %v1290_v33 = vadd.s32 4294967200, %v3147_v47 }
 0x237   :  { %v1330_v55 = vrot.slane %v1148_v11, %v1223_v36 }
 0x238   :  { %v1226_v51 = vsel %vm1225_vm3, %v1224_v14, %v1219_v15  ;;  %v1293_v26 = vsub.s32 %v1290_v33, %v3141_v40 }
 0x239   :  { %v4048_v50 = vpop.xlane.xlu0 %1121  ;;  %v1331_v48 = vsel %vm1225_vm3, %v1330_v55, %v1326_v59  ;;  %v1233_v8 = vsel %vm1232_vm4, %v1231_v13, %v1226_v51  ;;  %v1300_v55 = vsub.s32 %v1297_v37, %v3141_v40  ;;  %v1314_v13 = vsub.s32 %v1311_v1, %v3141_v40 }
 0x23a   :  { %v4050_v10 = vpop.xlane.xlu1 %1153  ;;  %v1336_v22 = vsel %vm1232_vm4, %v1335_v39, %v1331_v48  ;;  %v1245_v60 = vrot.slane %v4048_v50, %v1244_v12  ;;  %vm1722_vm3 = vcmp.eq.s32.totalorder %v3147_v47, 0  ;;  %vm1724_vm4 = vcmp.eq.s32.totalorder %v3147_v47, 1 }
 0x23b   :  { %v1345_v43 = vrot.slane %v4050_v10, %v1244_v12 }
 0x23d   :  { %v1120_v38 = vpop.xlane.xlu0 %1119 }
 0x23e   :  { %v1152_v6 = vpop.xlane.xlu1 %1151  ;;  %v1238_v23 = vrot.slane %v1120_v38, %v1237_v19 }
 0x23f   :  { %v1340_v18 = vrot.slane %v1152_v6, %v1237_v19  ;;  %v1279_v6 = vsub.s32 %v1276_v5, %v3141_v40 }
 0x240   :  { %v1240_v62 = vsel %vm1239_vm5, %v1238_v23, %v1233_v8 }
 0x241   :  { %v4052_v32 = vpop.xlane.xlu0 %1125  ;;  %v1341_v21 = vsel %vm1239_vm5, %v1340_v18, %v1336_v22  ;;  %v1247_v17 = vsel %vm1246_vm6, %v1245_v60, %v1240_v62 }
 0x242   :  { %v4054_v4 = vpop.xlane.xlu1 %1157  ;;  %v1346_v11 = vsel %vm1246_vm6, %v1345_v43, %v1341_v21  ;;  %v1259_v54 = vrot.slane %v4052_v32, %v1258_v63 }
 0x245   :  { %v4058_v9 = vpop.xlane.xlu0 %1123 }
 0x246   :  { %v4062_v46 = vpop.xlane.xlu1 %1155  ;;  %v1252_v20 = vrot.slane %v4058_v9, %v1251_v2  ;;  %v1355_v9 = vrot.slane %v4054_v4, %v1258_v63 }
 0x247   :  { %v1350_v61 = vrot.slane %v4062_v46, %v1251_v2 }
 0x248   :  { %v1254_v50 = vsel %vm1253_vm7, %v1252_v20, %v1247_v17 }
 0x249   :  { %v4068_v42 = vpop.xlane.xlu0 %1129  ;;  %v1351_v10 = vsel %vm1253_vm7, %v1350_v61, %v1346_v11  ;;  %v1261_v36 = vsel %vm1260_vm8, %v1259_v54, %v1254_v50 }
 0x24a   :  { %v4071_v57 = vpop.xlane.xlu1 %1161  ;;  %v1356_v25 = vsel %vm1260_vm8, %v1355_v9, %v1351_v10  ;;  %v1273_v14 = vrot.slane %v4068_v42, %v1272_v3  ;;  %v1307_v42 = vsub.s32 %v1304_v58, %v3141_v40 }
 0x24b   :  { %v1365_v27 = vrot.slane %v4071_v57, %v1272_v3 }
 0x24d   :  { %v1128_v24 = vpop.xlane.xlu0 %1127 }
 0x24e   :  { %v1160_v53 = vpop.xlane.xlu1 %1159  ;;  %v1266_v38 = vrot.slane %v1128_v24, %v1265_v29 }
 0x24f   :  { %v1360_v56 = vrot.slane %v1160_v53, %v1265_v29 }
 0x250   :  { %v1268_v41 = vsel %vm1267_vm9, %v1266_v38, %v1261_v36 }
 0x251   :  { %v4083_v49 = vpop.xlane.xlu0 %1133  ;;  %v1361_v4 = vsel %vm1267_vm9, %v1360_v56, %v1356_v25  ;;  %v1275_v44 = vsel %vm1274_vm10, %v1273_v14, %v1268_v41 }
 0x252   :  { %v4088_v35 = vpop.xlane.xlu1 %1165  ;;  %v1366_v24 = vsel %vm1274_vm10, %v1365_v27, %v1361_v4  ;;  %v1287_v34 = vrot.slane %v4083_v49, %v1286_v31 }
 0x253   :  { %v1375_v59 = vrot.slane %v4088_v35, %v1286_v31 }
 0x255   :  { %v1132_v16 = vpop.xlane.xlu0 %1131 }
 0x256   :  { %v1164_v52 = vpop.xlane.xlu1 %1163  ;;  %v1280_v32 = vrot.slane %v1132_v16, %v1279_v6 }
 0x257   :  { %v1370_v19 = vrot.slane %v1164_v52, %v1279_v6 }
 0x258   :  { %v1282_v15 = vsel %vm1281_vm11, %v1280_v32, %v1275_v44 }
 0x259   :  { %v1138_v46 = vpop.xlane.xlu0 %1137  ;;  %v1371_v53 = vsel %vm1281_vm11, %v1370_v19, %v1366_v24  ;;  %v1289_v23 = vsel %vm1288_vm12, %v1287_v34, %v1282_v15 }
 0x25a   :  { %v1170_v7 = vpop.xlane.xlu1 %1169  ;;  %v1376_v48 = vsel %vm1288_vm12, %v1375_v59, %v1371_v53  ;;  %v1301_v63 = vrot.slane %v1138_v46, %v1300_v55 }
 0x25b   :  { %v1385_v45 = vrot.slane %v1170_v7, %v1300_v55 }
 0x25d   :  { %v1136_v0 = vpop.xlane.xlu0 %1135 }
 0x25e   :  { %v1168_v30 = vpop.xlane.xlu1 %1167  ;;  %v1294_v12 = vrot.slane %v1136_v0, %v1293_v26 }
 0x25f   :  { %v1380_v57 = vrot.slane %v1168_v30, %v1293_v26 }
 0x260   :  { %v1296_v18 = vsel %vm1295_vm13, %v1294_v12, %v1289_v23 }
 0x261   :  { %v1140_v51 = vpop.xlane.xlu0 %1139  ;;  %v1381_v8 = vsel %vm1295_vm13, %v1380_v57, %v1376_v48  ;;  %v1303_v22 = vsel %vm1302_vm14, %v1301_v63, %v1296_v18 }
 0x262   :  { %v1172_v2 = vpop.xlane.xlu1 %1171  ;;  %v1308_v39 = vrot.slane %v1140_v51, %v1307_v42  ;;  %v1386_v20 = vsel %vm1302_vm14, %v1385_v45, %v1381_v8 }
 0x263   :  { %v1390_v49 = vrot.slane %v1172_v2, %v1307_v42 }
 0x264   :  { %v1310_v5 = vsel %vm1309_vm15, %v1308_v39, %v1303_v22 }
 0x265   :  { %v1142_v29 = vpop.xlane.xlu0 %1141  ;;  %v1391_v21 = vsel %vm1309_vm15, %v1390_v49, %v1386_v20 }
 0x266   :  { %v1174_v35 = vpop.xlane.xlu1 %1173  ;;  %v1315_v62 = vrot.slane %v1142_v29, %v1314_v13 }
 0x267   :  { %v1395_v60 = vrot.slane %v1174_v35, %v1314_v13 }
 0x268   :  { %v1317_v40 = vsel %vm1316_vm2, %v1315_v62, %v1310_v5 }
 0x269   :  { %v1396_v61 = vsel %vm1316_vm2, %v1395_v60, %v1391_v21 }
 0x26a   :  { %v1398_v43 = vsel %vm1397_vm0, %v1396_v61, %v1317_v40  ;;  %v1697_v52 = vpop.xlane.xlu1 %1696  ;;  %vm1727_vm0 = vcmp.eq.s32.totalorder %v3147_v47, 2 }
 0x26b   :  { %v1401_v28 = vsel %vm1400_vm1, %v1398_v43, 0.0  ;;  %2494 = vrcp.f32 %v1697_v52  ;;  %vm1730_vm1 = vcmp.eq.s32.totalorder %v3147_v47, 3  ;;  %v1728_v31 = vsel %vm1727_vm0, %v1697_v52, 0.0 }
 0x26c   :  { %1402 = vadd.xlane.f32.xlu0 %v1401_v28 }
 0x26d   :  { %v1714_v16 = vpop.xlane.xlu0 %1713 }
 0x26e   :  { %v1715_v17 = vmul.f32 0.5, %v1714_v16 }
 0x270   :  { %v1718_v3 = vsub.f32 0.0, %v1715_v17  ;;  %v1731_v36 = vsel %vm1730_vm1, %v1715_v17, 0.0 }
 0x272   :  { %v1719_v33 = vmul.f32 1.442695, %v1718_v3 }
 0x274   :  { %2496 = vpow2.f32 %v1719_v33 }
 0x275   :  { %v2495_v11 = vpop.eup %2494 }
 0x27e   :  { %v2497_v50 = vpop.eup %2496 }
 0x2f9   :  { %v1403_v38 = vpop.xlane.xlu0 %1402 }
 0x2fa   :  { %v1717_v6 = vmul.f32 %v2495_v11, %v1403_v38  ;;  %v1725_v56 = vsel %vm1724_vm4, %v1403_v38, 0.0 }
 0x2fc   :  { %v1721_v54 = vmul.f32 %v2497_v50, %v1717_v6 }
 0x2fe   :  { %v1723_v10 = vsel %vm1722_vm3, %v1721_v54, 0.0 }
 0x2ff   :  { %v1726_v9 = vadd.f32 %v1725_v56, %v1723_v10 }
 0x301   :  { %v1729_v46 = vadd.f32 %v1728_v31, %v1726_v9 }
 0x303   :  { %v1732_v37 = vadd.f32 %v1731_v36, %v1729_v46 }
 0x305   :  { %1733 = vst [vmem:[%s4135_s4] sm:$0x3] %v1732_v37 }

</bundles_post_ra>
